<compile_context>
chip_gen: v7x
topology: tpu7x:2x2x1
jax: 0.10.0
libtpu: 0.0.40
codegen_flags: <defaults>
</compile_context>

<pallas_src>
import jax
import jax.numpy as jnp
from jax.experimental import pallas as pl
from jax.experimental.pallas import tpu as pltpu

_LANE = 128


def _ceil_to(a, b):
    return -(-a // b) * b


def _dsconv_kernel(x_ref, halo_ref, wdw_ref, s1_ref, wpw_ref, s2_ref, out_ref):
    """One output-row stripe of fused DW(3x3)+BN+ReLU6 -> PW(1x1)+BN+ReLU6.

    x_ref    : (TH, W, Cin_p)    input rows [r*TH, r*TH+TH)            (f32)
    halo_ref : (2,  W, Cin_p)    input rows [r*TH+TH, r*TH+TH+2)       (f32)
    wdw_ref  : (9,  Cin_p)       depthwise taps, BN1 scale folded in   (f32)
    s1_ref   : (1,  Cin_p)       BN1 shift                             (f32)
    wpw_ref  : (Cin_p, Cout_p)   pointwise weights, BN2 scale folded   (bf16)
    s2_ref   : (1,  Cout_p)      BN2 shift                             (f32)
    out_ref  : (TH, Wo, Cout_p)  output stripe                         (bf16)
    """
    TH, Wo, Cout_p = out_ref.shape
    _, W, Cin_p = x_ref.shape

    # Halo'd input stripe: rows [r*TH, r*TH + TH + 2).
    xs = jnp.concatenate([x_ref[...], halo_ref[...]], axis=0)   # (TH+2, W, Cin_p)

    wdw = wdw_ref[...]                                          # (9, Cin_p)

    # Depthwise 3x3 at full width W (VPU MACs, f32 - v5e-safe).  kw taps come
    # from an incremental XLU roll computed right before use so only one
    # shifted slab is live at a time.  Wrapped columns land at w >= Wo and are
    # cropped after the pointwise matmul, so no masking is needed.
    acc = None
    xsh = xs
    for kw in range(3):
        if kw:
            xsh = pltpu.roll(xsh, shift=W - 1, axis=1)          # shift left 1 col
        for kh in range(3):
            term = xsh[kh:kh + TH] * wdw[kh * 3 + kw]
            acc = term if acc is None else acc + term           # (TH, W, Cin_p) f32

    # BN1 shift + ReLU6, flatten rows (layout no-op: W % 8 == 0), bf16 for MXU.
    y = jnp.clip(acc.reshape(TH * W, Cin_p) + s1_ref[0], 0.0, 6.0)
    y = y.astype(jnp.bfloat16)

    # Pointwise 1x1 conv == channel matmul (MXU, bf16 in / f32 accumulate).
    z = jnp.dot(y, wpw_ref[...], preferred_element_type=jnp.float32)
    z = jnp.clip(z + s2_ref[0], 0.0, 6.0).reshape(TH, W, Cout_p)

    # Crop the W halo columns once and store (lane-dense Cout_p, bf16).
    out_ref[...] = z[:, :Wo, :].astype(out_ref.dtype)


def prepare_dsconv_params(w_dw, w_pw, bn1_params, bn2_params, eps=1e-5):
    """Fold inference-mode BatchNorm into the conv weights and pad channels.

    w_dw: (Cin, 1, 3, 3) depthwise OIHW; w_pw: (Cout, Cin, 1, 1) pointwise OIHW.
    bn*_params: (gamma, beta, running_mean, running_var).
    Call once per layer, outside the per-step hot path.
    """
    Cin = w_dw.shape[0]
    Cout = w_pw.shape[0]
    Cin_p = _ceil_to(Cin, _LANE)
    Cout_p = _ceil_to(Cout, _LANE)

    def fold(gamma, beta, mean, var):
        scale = gamma / jnp.sqrt(var + eps)
        return scale.astype(jnp.float32), (beta - mean * scale).astype(jnp.float32)

    sc1, sh1 = fold(*bn1_params)                                 # (Cin,)
    sc2, sh2 = fold(*bn2_params)                                 # (Cout,)

    # Depthwise: (Cin,1,3,3) -> (9, Cin), fold BN1 scale, pad channel lanes.
    wdw = jnp.transpose(w_dw[:, 0], (1, 2, 0)).reshape(9, Cin) * sc1[None, :]
    wdw = jnp.pad(wdw, ((0, 0), (0, Cin_p - Cin))).astype(jnp.float32)

    # Pointwise: (Cout,Cin,1,1) -> (Cin, Cout), fold BN2 scale, bf16, pad lanes.
    wpw = jnp.transpose(w_pw[:, :, 0, 0], (1, 0)) * sc2[None, :]
    wpw = jnp.pad(wpw, ((0, Cin_p - Cin), (0, Cout_p - Cout))).astype(jnp.bfloat16)

    # Padded lanes stay inert: zero taps / zero shifts -> ReLU6(0) = 0 -> zero
    # wpw rows / cols, and padded Cout lanes are sliced off after the kernel.
    s1 = jnp.pad(sh1, (0, Cin_p - Cin)).reshape(1, Cin_p).astype(jnp.float32)
    s2 = jnp.pad(sh2, (0, Cout_p - Cout)).reshape(1, Cout_p).astype(jnp.float32)
    return dict(wdw=wdw, s1=s1, wpw=wpw, s2=s2,
                Cin=Cin, Cout=Cout, Cin_p=Cin_p, Cout_p=Cout_p)


def _pick_stripe_rows(Ho, W_p, Cin_p, Cout_p, out_bytes,
                      vmem_budget_bytes=20 * 1024 * 1024):
    """Even stripe height TH from a VMEM budget and an MXU-M target."""
    # Per-output-row VMEM: double-buffered x block + in-kernel temporaries
    # (halo'd copy, one live rolled slab, f32 acc, bf16 activations, f32
    # pointwise result) + double-buffered output block.
    per_row = W_p * (Cin_p * (2 * 4 + 4 + 4 + 4 + 2)
                     + Cout_p * (4 + 2 * out_bytes))
    fixed = (2 * 2 * W_p * Cin_p * 4          # 2-row halo block, double-buffered
             + 2 * Cin_p * Cout_p * 2         # pointwise weights, double-buffered
             + 2 * 10 * Cin_p * 4 + 2 * Cout_p * 4)
    th_cap = max(2, (vmem_budget_bytes - fixed) // per_row)
    th_cap = max(2, th_cap - th_cap % 2)
    th_want = max(8, -(-2048 // W_p))         # amortize ~600-cycle step overhead,
    th_want += th_want % 2                    # feed the 256-wide MXU (M = TH*W)
    th_max = Ho if Ho % 2 == 0 else max(2, Ho - 1)
    return int(max(2, min(th_cap, th_want, th_max)))


def depth_separable_conv2d_nhwc(x_nhwc, params, *, out_dtype=jnp.bfloat16,
                                stripe_rows=None):
    """Fused depthwise-separable conv on NHWC input.  Returns (N, Ho, Wo, Cout)."""
    N, H, W, Cin = x_nhwc.shape
    assert Cin == params["Cin"] and H >= 3 and W >= 3
    Cin_p, Cout_p, Cout = params["Cin_p"], params["Cout_p"], params["Cout"]
    Ho, Wo = H - 2, W - 2                      # stride=1, padding=0 (VALID)
    W_p = _ceil_to(W, 8)                       # keep MXU-side reshapes layout-free

    x = x_nhwc.astype(jnp.float32)
    if W_p != W or Cin_p != Cin:
        x = jnp.pad(x, ((0, 0), (0, 0), (0, W_p - W), (0, Cin_p - Cin)))

    out_bytes = jnp.dtype(out_dtype).itemsize
    TH = stripe_rows if stripe_rows is not None else _pick_stripe_rows(
        Ho, W_p, Cin_p, Cout_p, out_bytes)
    assert TH >= 2 and TH % 2 == 0, TH         # halo index trick needs even TH
    R = -(-Ho // TH)                           # row stripes (last may be ragged)
    halo_max = (H + 1) // 2 - 1                # last valid 2-row block index

    out_nhwc = pl.pallas_call(
        _dsconv_kernel,
        out_shape=jax.ShapeDtypeStruct((N, Ho, Wo, Cout_p), out_dtype),
        grid_spec=pltpu.PrefetchScalarGridSpec(
            num_scalar_prefetch=0,
            grid=(N, R),
            in_specs=[
                # Stripe body: input rows [r*TH, r*TH+TH).
                pl.BlockSpec((None, TH, W_p, Cin_p), lambda n, r: (n, r, 0, 0)),
                # 2-row halo: input rows [r*TH+TH, r*TH+TH+2).  For the ragged
                # last stripe the index is clamped in-bounds (its content is
                # then unused - the body block already reaches row H-1).
                pl.BlockSpec((None, 2, W_p, Cin_p),
                             lambda n, r: (n, jnp.minimum((r + 1) * (TH // 2),
                                                          halo_max), 0, 0)),
                # Constant-index operands: fetched once, revisited every step.
                # TODO(synk): on v7x, single-buffer these with
                # pipeline_mode=pl.Buffered(1) to reclaim VMEM headroom.
                pl.BlockSpec((9, Cin_p), lambda n, r: (0, 0)),
                pl.BlockSpec((1, Cin_p), lambda n, r: (0, 0)),
                pl.BlockSpec((Cin_p, Cout_p), lambda n, r: (0, 0)),
                pl.BlockSpec((1, Cout_p), lambda n, r: (0, 0)),
            ],
            out_specs=pl.BlockSpec((None, TH, Wo, Cout_p),
                                   lambda n, r: (n, r, 0, 0)),
        ),
        compiler_params=pltpu.CompilerParams(
            dimension_semantics=("parallel", "parallel"),
            vmem_limit_bytes=48 * 1024 * 1024,
        ),
    )(x, x, params["wdw"], params["s1"], params["wpw"], params["s2"])

    # TODO(synk): for very wide layers (Cin_p*Cout_p >> VMEM budget) add a
    # Cout grid axis tiled at 256-512 instead of falling back to tiny TH.
    if Cout_p != Cout:
        out_nhwc = out_nhwc[..., :Cout]        # drop padded channel lanes
    return out_nhwc


def depth_separable_conv2d(x_nchw, w_dw, w_pw, bn1_params, bn2_params,
                           eps=1e-5, stripe_rows=None):
    """PyTorch-facing wrapper: NCHW activations, OIHW weights, f32 output.

    NCHW<->NHWC conversion lives only here; use prepare_dsconv_params() +
    depth_separable_conv2d_nhwc() directly to keep it out of the hot path.
    """
    params = prepare_dsconv_params(w_dw, w_pw, bn1_params, bn2_params, eps)
    x_nhwc = jnp.transpose(x_nchw, (0, 2, 3, 1))
    out = depth_separable_conv2d_nhwc(x_nhwc, params, stripe_rows=stripe_rows)
    return jnp.transpose(out, (0, 3, 1, 2)).astype(jnp.float32)


def _reference(x, w_dw, w_pw, bn1_params, bn2_params, eps=1e-5):
    """Pure-JAX reference (NCHW, matches PyTorch conv/BN(eval)/ReLU6 semantics)."""
    def bn(t, params):
        g, b, m, v = params
        return (t - m[None, :, None, None]) / jnp.sqrt(v[None, :, None, None] + eps) \
               * g[None, :, None, None] + b[None, :, None, None]

    y = jax.lax.conv_general_dilated(
        x, w_dw, window_strides=(1, 1), padding='VALID',
        dimension_numbers=('NCHW', 'OIHW', 'NCHW'),
        feature_group_count=x.shape[1])
    y = jnp.clip(bn(y, bn1_params), 0.0, 6.0)
    z = jax.lax.conv_general_dilated(
        y, w_pw, window_strides=(1, 1), padding='VALID',
        dimension_numbers=('NCHW', 'OIHW', 'NCHW'))
    z = jnp.clip(bn(z, bn2_params), 0.0, 6.0)
    return z


if __name__ == "__main__":
    key = jax.random.PRNGKey(0)

    def run_case(case_key, N, Cin, Cout, H, W, stripe_rows=None):
        k = jax.random.split(case_key, 10)
        x = jax.random.normal(k[0], (N, Cin, H, W), jnp.float32)
        w_dw = jax.random.normal(k[1], (Cin, 1, 3, 3), jnp.float32) * 0.3
        w_pw = jax.random.normal(k[2], (Cout, Cin, 1, 1), jnp.float32) * 0.3
        # TODO(synk): training-mode BatchNorm2d (batch statistics) is not
        # modeled; inference-mode running stats are used here.
        bn1 = (jax.random.uniform(k[3], (Cin,), minval=0.5, maxval=1.5),
               jax.random.normal(k[4], (Cin,)) * 0.1,
               jax.random.normal(k[5], (Cin,)) * 0.1,
               jax.random.uniform(k[6], (Cin,), minval=0.5, maxval=1.5))
        bn2 = (jax.random.uniform(k[7], (Cout,), minval=0.5, maxval=1.5),
               jax.random.normal(k[8], (Cout,)) * 0.1,
               jax.random.normal(k[9], (Cout,)) * 0.1,
               jnp.ones((Cout,), jnp.float32))

        out = jax.block_until_ready(
            depth_separable_conv2d(x, w_dw, w_pw, bn1, bn2,
                                   stripe_rows=stripe_rows))
        ref = _reference(x, w_dw, w_pw, bn1, bn2)
        assert out.shape == (N, Cout, H - 2, W - 2), out.shape
        # bf16 MXU inputs + bf16 output writeback -> loose tolerance.
        err = float(jnp.max(jnp.abs(out - ref)))
        assert jnp.allclose(out, ref, atol=1e-1, rtol=1e-1), err

    keys = jax.random.split(key, 3)
    # Single full-height stripe per image.
    run_case(keys[0], N=2, Cin=4, Cout=8, H=16, W=16)
    # Odd spatial size: exercises W padding to 8 and the ragged last stripe.
    run_case(keys[1], N=1, Cin=3, Cout=5, H=13, W=13)
    # Forced multi-stripe grid with a ragged last stripe + clamped halo index.
    run_case(keys[2], N=2, Cin=4, Cout=8, H=16, W=16, stripe_rows=4)

    print("KERNEL_OK")
</pallas_src>

<mosaic_0001>
module attributes {stable_mosaic.version = 11 : i64} {
  func.func @_dsconv_kernel(%arg0: i32, %arg1: i32, %arg2: memref<1x14x16x128xf32, #tpu.memory_space<vmem>>, %arg3: memref<1x2x16x128xf32, #tpu.memory_space<vmem>>, %arg4: memref<9x128xf32, #tpu.memory_space<vmem>>, %arg5: memref<1x128xf32, #tpu.memory_space<vmem>>, %arg6: memref<128x128xbf16, #tpu.memory_space<vmem>>, %arg7: memref<1x128xf32, #tpu.memory_space<vmem>>, %arg8: memref<1x14x14x128xbf16, #tpu.memory_space<vmem>>) attributes {dimension_semantics = [#tpu.dimension_semantics<parallel>, #tpu.dimension_semantics<parallel>], iteration_bounds = array<i64: 2, 1>, scalar_prefetch = 0 : i64, scratch_operands = 0 : i64, tpu.core_type = #tpu.core_type<tc>, window_params = [{transform_indices = @transform_0, window_bounds = array<i64: 1, 14, 16, 128>}, {transform_indices = @transform_1, window_bounds = array<i64: 1, 2, 16, 128>}, {pipeline_mode = #tpu.pipeline_mode<synchronous>, transform_indices = @transform_2, window_bounds = array<i64: 9, 128>}, {pipeline_mode = #tpu.pipeline_mode<synchronous>, transform_indices = @transform_3, window_bounds = array<i64: 1, 128>}, {pipeline_mode = #tpu.pipeline_mode<synchronous>, transform_indices = @transform_4, window_bounds = array<i64: 128, 128>}, {pipeline_mode = #tpu.pipeline_mode<synchronous>, transform_indices = @transform_5, window_bounds = array<i64: 1, 128>}, {transform_indices = @transform_6, window_bounds = array<i64: 1, 14, 14, 128>}]} {
    %c0 = arith.constant 0 : index
    %c0_0 = arith.constant 0 : index
    %c0_1 = arith.constant 0 : index
    %c0_2 = arith.constant 0 : index
    %0 = vector.load %arg2[%c0, %c0_0, %c0_1, %c0_2] : memref<1x14x16x128xf32, #tpu.memory_space<vmem>>, vector<1x14x16x128xf32>
    %1 = vector.shape_cast %0 : vector<1x14x16x128xf32> to vector<14x16x128xf32>
    %c0_3 = arith.constant 0 : index
    %c0_4 = arith.constant 0 : index
    %c0_5 = arith.constant 0 : index
    %c0_6 = arith.constant 0 : index
    %2 = vector.load %arg3[%c0_3, %c0_4, %c0_5, %c0_6] : memref<1x2x16x128xf32, #tpu.memory_space<vmem>>, vector<1x2x16x128xf32>
    %3 = vector.shape_cast %2 : vector<1x2x16x128xf32> to vector<2x16x128xf32>
    %4 = tpu.concatenate %1, %3 in 0 : vector<14x16x128xf32>, vector<2x16x128xf32> -> vector<16x16x128xf32>
    %c0_7 = arith.constant 0 : index
    %c0_8 = arith.constant 0 : index
    %5 = vector.load %arg4[%c0_7, %c0_8] : memref<9x128xf32, #tpu.memory_space<vmem>>, vector<9x128xf32>
    %6 = vector.extract_strided_slice %4 {offsets = [0, 0, 0], sizes = [14, 16, 128], strides = [1, 1, 1]} : vector<16x16x128xf32> to vector<14x16x128xf32>
    %7 = vector.extract_strided_slice %5 {offsets = [0, 0], sizes = [1, 128], strides = [1, 1]} : vector<9x128xf32> to vector<1x128xf32>
    %8 = vector.shape_cast %7 : vector<1x128xf32> to vector<128xf32>
    %9 = vector.shape_cast %8 : vector<128xf32> to vector<1x1x128xf32>
    %10 = vector.broadcast %9 : vector<1x1x128xf32> to vector<14x16x128xf32>
    %11 = arith.mulf %6, %10 : vector<14x16x128xf32>
    %12 = vector.extract_strided_slice %4 {offsets = [1, 0, 0], sizes = [14, 16, 128], strides = [1, 1, 1]} : vector<16x16x128xf32> to vector<14x16x128xf32>
    %13 = vector.extract_strided_slice %5 {offsets = [3, 0], sizes = [1, 128], strides = [1, 1]} : vector<9x128xf32> to vector<1x128xf32>
    %14 = vector.shape_cast %13 : vector<1x128xf32> to vector<128xf32>
    %15 = vector.shape_cast %14 : vector<128xf32> to vector<1x1x128xf32>
    %16 = vector.broadcast %15 : vector<1x1x128xf32> to vector<14x16x128xf32>
    %17 = arith.mulf %12, %16 : vector<14x16x128xf32>
    %18 = arith.addf %11, %17 : vector<14x16x128xf32>
    %19 = vector.extract_strided_slice %4 {offsets = [2, 0, 0], sizes = [14, 16, 128], strides = [1, 1, 1]} : vector<16x16x128xf32> to vector<14x16x128xf32>
    %20 = vector.extract_strided_slice %5 {offsets = [6, 0], sizes = [1, 128], strides = [1, 1]} : vector<9x128xf32> to vector<1x128xf32>
    %21 = vector.shape_cast %20 : vector<1x128xf32> to vector<128xf32>
    %22 = vector.shape_cast %21 : vector<128xf32> to vector<1x1x128xf32>
    %23 = vector.broadcast %22 : vector<1x1x128xf32> to vector<14x16x128xf32>
    %24 = arith.mulf %19, %23 : vector<14x16x128xf32>
    %25 = arith.addf %18, %24 : vector<14x16x128xf32>
    %c15_i32 = arith.constant 15 : i32
    %26 = tpu.dynamic_rotate %4 by %c15_i32 dim 1 : vector<16x16x128xf32>, i32 -> vector<16x16x128xf32>
    %27 = vector.extract_strided_slice %26 {offsets = [0, 0, 0], sizes = [14, 16, 128], strides = [1, 1, 1]} : vector<16x16x128xf32> to vector<14x16x128xf32>
    %28 = vector.extract_strided_slice %5 {offsets = [1, 0], sizes = [1, 128], strides = [1, 1]} : vector<9x128xf32> to vector<1x128xf32>
    %29 = vector.shape_cast %28 : vector<1x128xf32> to vector<128xf32>
    %30 = vector.shape_cast %29 : vector<128xf32> to vector<1x1x128xf32>
    %31 = vector.broadcast %30 : vector<1x1x128xf32> to vector<14x16x128xf32>
    %32 = arith.mulf %27, %31 : vector<14x16x128xf32>
    %33 = arith.addf %25, %32 : vector<14x16x128xf32>
    %34 = vector.extract_strided_slice %26 {offsets = [1, 0, 0], sizes = [14, 16, 128], strides = [1, 1, 1]} : vector<16x16x128xf32> to vector<14x16x128xf32>
    %35 = vector.extract_strided_slice %5 {offsets = [4, 0], sizes = [1, 128], strides = [1, 1]} : vector<9x128xf32> to vector<1x128xf32>
    %36 = vector.shape_cast %35 : vector<1x128xf32> to vector<128xf32>
    %37 = vector.shape_cast %36 : vector<128xf32> to vector<1x1x128xf32>
    %38 = vector.broadcast %37 : vector<1x1x128xf32> to vector<14x16x128xf32>
    %39 = arith.mulf %34, %38 : vector<14x16x128xf32>
    %40 = arith.addf %33, %39 : vector<14x16x128xf32>
    %41 = vector.extract_strided_slice %26 {offsets = [2, 0, 0], sizes = [14, 16, 128], strides = [1, 1, 1]} : vector<16x16x128xf32> to vector<14x16x128xf32>
    %42 = vector.extract_strided_slice %5 {offsets = [7, 0], sizes = [1, 128], strides = [1, 1]} : vector<9x128xf32> to vector<1x128xf32>
    %43 = vector.shape_cast %42 : vector<1x128xf32> to vector<128xf32>
    %44 = vector.shape_cast %43 : vector<128xf32> to vector<1x1x128xf32>
    %45 = vector.broadcast %44 : vector<1x1x128xf32> to vector<14x16x128xf32>
    %46 = arith.mulf %41, %45 : vector<14x16x128xf32>
    %47 = arith.addf %40, %46 : vector<14x16x128xf32>
    %c15_i32_9 = arith.constant 15 : i32
    %48 = tpu.dynamic_rotate %26 by %c15_i32_9 dim 1 : vector<16x16x128xf32>, i32 -> vector<16x16x128xf32>
    %49 = vector.extract_strided_slice %48 {offsets = [0, 0, 0], sizes = [14, 16, 128], strides = [1, 1, 1]} : vector<16x16x128xf32> to vector<14x16x128xf32>
    %50 = vector.extract_strided_slice %5 {offsets = [2, 0], sizes = [1, 128], strides = [1, 1]} : vector<9x128xf32> to vector<1x128xf32>
    %51 = vector.shape_cast %50 : vector<1x128xf32> to vector<128xf32>
    %52 = vector.shape_cast %51 : vector<128xf32> to vector<1x1x128xf32>
    %53 = vector.broadcast %52 : vector<1x1x128xf32> to vector<14x16x128xf32>
    %54 = arith.mulf %49, %53 : vector<14x16x128xf32>
    %55 = arith.addf %47, %54 : vector<14x16x128xf32>
    %56 = vector.extract_strided_slice %48 {offsets = [1, 0, 0], sizes = [14, 16, 128], strides = [1, 1, 1]} : vector<16x16x128xf32> to vector<14x16x128xf32>
    %57 = vector.extract_strided_slice %5 {offsets = [5, 0], sizes = [1, 128], strides = [1, 1]} : vector<9x128xf32> to vector<1x128xf32>
    %58 = vector.shape_cast %57 : vector<1x128xf32> to vector<128xf32>
    %59 = vector.shape_cast %58 : vector<128xf32> to vector<1x1x128xf32>
    %60 = vector.broadcast %59 : vector<1x1x128xf32> to vector<14x16x128xf32>
    %61 = arith.mulf %56, %60 : vector<14x16x128xf32>
    %62 = arith.addf %55, %61 : vector<14x16x128xf32>
    %63 = vector.extract_strided_slice %48 {offsets = [2, 0, 0], sizes = [14, 16, 128], strides = [1, 1, 1]} : vector<16x16x128xf32> to vector<14x16x128xf32>
    %64 = vector.extract_strided_slice %5 {offsets = [8, 0], sizes = [1, 128], strides = [1, 1]} : vector<9x128xf32> to vector<1x128xf32>
    %65 = vector.shape_cast %64 : vector<1x128xf32> to vector<128xf32>
    %66 = vector.shape_cast %65 : vector<128xf32> to vector<1x1x128xf32>
    %67 = vector.broadcast %66 : vector<1x1x128xf32> to vector<14x16x128xf32>
    %68 = arith.mulf %63, %67 : vector<14x16x128xf32>
    %69 = arith.addf %62, %68 : vector<14x16x128xf32>
    %70 = vector.shape_cast %69 : vector<14x16x128xf32> to vector<224x128xf32>
    %c0_10 = arith.constant 0 : index
    %c0_11 = arith.constant 0 : index
    %71 = vector.load %arg5[%c0_10, %c0_11] : memref<1x128xf32, #tpu.memory_space<vmem>>, vector<1x128xf32>
    %72 = vector.shape_cast %71 : vector<1x128xf32> to vector<128xf32>
    %73 = vector.shape_cast %72 : vector<128xf32> to vector<1x128xf32>
    %74 = vector.broadcast %73 : vector<1x128xf32> to vector<224x128xf32>
    %75 = arith.addf %70, %74 : vector<224x128xf32>
    %cst = arith.constant 0.000000e+00 : f32
    %cst_12 = arith.constant 6.000000e+00 : f32
    %76 = vector.broadcast %cst : f32 to vector<224x128xf32>
    %77 = arith.maximumf %76, %75 : vector<224x128xf32>
    %78 = vector.broadcast %cst_12 : f32 to vector<224x128xf32>
    %79 = arith.minimumf %78, %77 : vector<224x128xf32>
    %80 = arith.truncf %79 : vector<224x128xf32> to vector<224x128xbf16>
    %c0_13 = arith.constant 0 : index
    %c0_14 = arith.constant 0 : index
    %81 = vector.load %arg6[%c0_13, %c0_14] : memref<128x128xbf16, #tpu.memory_space<vmem>>, vector<128x128xbf16>
    %cst_15 = arith.constant dense<0.000000e+00> : vector<224x128xf32>
    %82 = tpu.matmul %80, %81, %cst_15 {dimension_numbers = #tpu.dot_dimension_numbers<[1], [0], [0], [1], [0, 0, 1, 1], [], []>} : vector<224x128xbf16>, vector<128x128xbf16>, vector<224x128xf32> -> vector<224x128xf32>
    %c0_16 = arith.constant 0 : index
    %c0_17 = arith.constant 0 : index
    %83 = vector.load %arg7[%c0_16, %c0_17] : memref<1x128xf32, #tpu.memory_space<vmem>>, vector<1x128xf32>
    %84 = vector.shape_cast %83 : vector<1x128xf32> to vector<128xf32>
    %85 = vector.shape_cast %84 : vector<128xf32> to vector<1x128xf32>
    %86 = vector.broadcast %85 : vector<1x128xf32> to vector<224x128xf32>
    %87 = arith.addf %82, %86 : vector<224x128xf32>
    %cst_18 = arith.constant 0.000000e+00 : f32
    %cst_19 = arith.constant 6.000000e+00 : f32
    %88 = vector.broadcast %cst_18 : f32 to vector<224x128xf32>
    %89 = arith.maximumf %88, %87 : vector<224x128xf32>
    %90 = vector.broadcast %cst_19 : f32 to vector<224x128xf32>
    %91 = arith.minimumf %90, %89 : vector<224x128xf32>
    %92 = vector.shape_cast %91 : vector<224x128xf32> to vector<14x16x128xf32>
    %93 = vector.extract_strided_slice %92 {offsets = [0, 0, 0], sizes = [14, 14, 128], strides = [1, 1, 1]} : vector<14x16x128xf32> to vector<14x14x128xf32>
    %94 = arith.truncf %93 : vector<14x14x128xf32> to vector<14x14x128xbf16>
    %c0_20 = arith.constant 0 : index
    %c0_21 = arith.constant 0 : index
    %c0_22 = arith.constant 0 : index
    %c0_23 = arith.constant 0 : index
    %95 = vector.load %arg8[%c0_20, %c0_21, %c0_22, %c0_23] : memref<1x14x14x128xbf16, #tpu.memory_space<vmem>>, vector<1x14x14x128xbf16>
    %96 = vector.shape_cast %95 : vector<1x14x14x128xbf16> to vector<14x14x128xbf16>
    %97 = vector.shape_cast %94 : vector<14x14x128xbf16> to vector<1x14x14x128xbf16>
    tpu.vector_store %arg8[%c0_20, %c0_21, %c0_22, %c0_23], %97 {strides = array<i32>} : memref<1x14x14x128xbf16, #tpu.memory_space<vmem>>, vector<1x14x14x128xbf16>,
    return
  }
  func.func @transform_0(%arg0: i32, %arg1: i32) -> (i32, i32, i32, i32) {
    %c0_i32 = arith.constant 0 : i32
    %c0_i32_0 = arith.constant 0 : i32
    %c0_i32_1 = arith.constant 0 : i32
    return %arg0, %arg1, %c0_i32, %c0_i32_0 : i32, i32, i32, i32
  }
  func.func @transform_1(%arg0: i32, %arg1: i32) -> (i32, i32, i32, i32) {
    %c1_i32 = arith.constant 1 : i32
    %0 = arith.addi %arg1, %c1_i32 : i32
    %c7_i32 = arith.constant 7 : i32
    %1 = arith.muli %0, %c7_i32 : i32
    %c7_i32_0 = arith.constant 7 : i32
    %2 = arith.minsi %1, %c7_i32_0 : i32
    %c0_i32 = arith.constant 0 : i32
    %c0_i32_1 = arith.constant 0 : i32
    %c0_i32_2 = arith.constant 0 : i32
    return %arg0, %2, %c0_i32, %c0_i32_1 : i32, i32, i32, i32
  }
  func.func @transform_2(%arg0: i32, %arg1: i32) -> (i32, i32) {
    %c0_i32 = arith.constant 0 : i32
    %c0_i32_0 = arith.constant 0 : i32
    %c0_i32_1 = arith.constant 0 : i32
    return %c0_i32, %c0_i32_0 : i32, i32
  }
  func.func @transform_3(%arg0: i32, %arg1: i32) -> (i32, i32) {
    %c0_i32 = arith.constant 0 : i32
    %c0_i32_0 = arith.constant 0 : i32
    %c0_i32_1 = arith.constant 0 : i32
    return %c0_i32, %c0_i32_0 : i32, i32
  }
  func.func @transform_4(%arg0: i32, %arg1: i32) -> (i32, i32) {
    %c0_i32 = arith.constant 0 : i32
    %c0_i32_0 = arith.constant 0 : i32
    %c0_i32_1 = arith.constant 0 : i32
    return %c0_i32, %c0_i32_0 : i32, i32
  }
  func.func @transform_5(%arg0: i32, %arg1: i32) -> (i32, i32) {
    %c0_i32 = arith.constant 0 : i32
    %c0_i32_0 = arith.constant 0 : i32
    %c0_i32_1 = arith.constant 0 : i32
    return %c0_i32, %c0_i32_0 : i32, i32
  }
  func.func @transform_6(%arg0: i32, %arg1: i32) -> (i32, i32, i32, i32) {
    %c0_i32 = arith.constant 0 : i32
    %c0_i32_0 = arith.constant 0 : i32
    %c0_i32_1 = arith.constant 0 : i32
    return %arg0, %arg1, %c0_i32, %c0_i32_0 : i32, i32, i32, i32
  }
}

</mosaic_0001>

<bundles_post_ra>
// kernel: tpu_custom_call.1
= control target key start
LH: loop header
LB: loop body
LE: loop exit
PB: predicated region body
PF: predicated region fallthrough
CT: control target
= control target key end

     0   :  { %s3510_s0 = inlined_call_operand.hbm [shape: f32[2,16,16,128], index: 0, kind: input, shape index: {}]   ;;  %s3511_s1 = inlined_call_operand.hbm [shape: f32[2,16,16,128], index: 1, kind: input, shape index: {}]   ;;  %s3512_s2 = inlined_call_operand.hbm [shape: f32[9,128], index: 2, kind: input, shape index: {}]   ;;  %s3513_s3 = inlined_call_operand.vmem [shape: f32[1,128], index: 3, kind: input, shape index: {}]   ;;  %s3514_s4 = inlined_call_operand.hbm [shape: bf16[128,128], index: 4, kind: input, shape index: {}]   ;;  %s3515_s5 = inlined_call_operand.vmem [shape: f32[1,128], index: 5, kind: input, shape index: {}]   ;;  %s3516_s6 = inlined_call_operand.vmem [shape: bf16[2,14,14,128], index: 6, kind: output, shape index: {}]  }
   0x1   :  { %3532 = sst [smem:[#allocation18_spill]] %s3510_s0 }
   0x2   :  { %3533 = sst [smem:[#allocation19_spill]] %s3512_s2 }
   0x3   :  { %3534 = sst [smem:[#allocation20_spill]] %s3514_s4 }
   0x4   :  { %11 = vsyncpa [#allocation3], 0 }
   0x5   :  { %13 = vsyncpa [#allocation3 + $0x1], 0 }
   0x6   :  { %14 = vsyncpa [#allocation5], 0 }
   0x7   :  { %16 = vsyncpa [#allocation5 + $0x1], 0 }
   0x8   :  { %17 = vsyncpa [#allocation8], 0  ;;  %s2244_s21 = smov 0   ;;  %s2246_s22 = smov 0  }
   0x9   :  { %s2248_s23 = smov 0   ;;  %s2250_s24 = smov 0  }
   0xa   :  { %s2252_s25 = smov 0   ;;  %s2254_s26 = smov 0  }
   0xb LB: > { %s3521_s27 = sadd.s32 4294967295, %s2199_s26   ;;  %p57_p0 = scmp.ne.s32.totalorder %s2183_s22, %s2179_s21  ;;  %s2199_s26 = sphi %s2254_s26, %s23_s26   ;;  %s2195_s25 = sphi %s2252_s25, %s3563_s25   ;;  %s2191_s24 = sphi %s2250_s24, %s3562_s24   ;;  %s2187_s23 = sphi %s2248_s23, %s3561_s23   ;;  %s2183_s22 = sphi %s2246_s22, %s3560_s22   ;;  %s2179_s21 = sphi %s2244_s21, %s3559_s21  }
   0xc   : > { %p2276_p1 = scmp.eq.s32.totalorder %s3521_s27, 0  ;;  %p1750_p2 = scmp.ge.s32.totalorder %s2199_s26, 1 }
   0xd   : > { %p216_p3 = scmp.lt.s32.totalorder %s2199_s26, 3  ;;  %s2201_s7 = smov [#allocation6]  }
   0xe   : > { %s3535_s28 = scalar_select %p2276_p1, 1, 0 }
   0xf   : > { %p2284_p4 = por %p2276_p1, %p57_p0  ;;  %p2288_p5 = pnand %p1750_p2, %p216_p3 }
  0x10   : > { %s228_s8 = sshll.u32 %s2201_s7, 4  ;;  %s2202_s10 = smov [#allocation7]   ;;  %s229_s8 = int_to_ptr.vmem [resolvable:$true] %s228_s8 }
  0x11   : > { %s3536_s29 = scalar_select %p2284_p4, 1, 0 }
  0x12   : > { %s3537_s30 = scalar_select %p2288_p5, 1, 0 }
  0x13   : > { %p1934_p6 = pneg %p2288_p5  ;;  %s244_s11 = sshll.u32 %s2202_s10, 4  ;;  %s2300_s11 = int_to_ptr.vmem [resolvable:$true] %s244_s11 }
  0x14   : > { %s3539_s2 = sld [smem:[#allocation19_spill]] }
  0x15   : > { %p2296_p7 = pnand %p1934_p6, %p2276_p1 }
  0x17   : > { %p2023_p9 = pneg %p2296_p7 }
  0x1a   : > { %s2021_s14 = scalar_lea.hbm %s3539_s2, 256 }
  0x1b   : > { %p2022_p8 = scmp.ne.s32.totalorder %s3539_s2, %s2021_s14  ;;  %p2028_p12 = scmp.lt.u32.totalorder %s2021_s14, %s3539_s2 }
  0x1d   : > { %p2024_p10 = pnand %p2023_p9, %p2022_p8 }
  0x1f   : > { %p2025_p11 = pneg %p2024_p10 }
  0x21   : > { %p2030_p13 = pnand %p2028_p12, %p2025_p11 }
  0x23   : > { %2033 = shalt.err (!%p2030_p13)
}
  0x24   : > { %s2034_s19 = scalar_lea.vmem %s229_s8, 256  ;;  %p2042_p6 = scmp.lt.s32.totalorder %s229_s8, %s229_s8 }
  0x25   : > { %p2035_p0 = scmp.ne.s32.totalorder %s229_s8, %s2034_s19  ;;  %p2043_p1 = scmp.lt.s32.totalorder %s2034_s19, %s2034_s19 }
  0x27   : > { %p2037_p2 = pnand %p2035_p0, %p2023_p9  ;;  %p2044_p4 = por %p2043_p1, %p2042_p6 }
  0x29   : > { %p2038_p3 = pneg %p2037_p2 }
  0x2b   : > { %p2045_p5 = pnand %p2044_p4, %p2038_p3 }
  0x2d   : > { %2048 = shalt.err (!%p2045_p5)
}
  0x2e   : > { %s3522_s20 = smov 128   ;;  %s3524_s21 = smov 8  }
  0x2f   : > { %1937 = dma.hbm_to_vmem [thread:$0]  (!%p2296_p7), %s3539_s2, 256, %s229_s8, [#allocation5], %s3522_s20, %s3522_s20, %s3524_s21  }
  0x30   : > { %s3540_s4 = sld [smem:[#allocation20_spill]] }
  0x36   : > { %s2049_s14 = scalar_lea.hbm %s3540_s4, 1024 }
  0x37   : > { %p2050_p1 = scmp.ne.s32.totalorder %s3540_s4, %s2049_s14  ;;  %p2056_p8 = scmp.lt.u32.totalorder %s2049_s14, %s3540_s4 }
  0x39   : > { %p2052_p4 = pnand %p2050_p1, %p2023_p9 }
  0x3b   : > { %p2053_p5 = pneg %p2052_p4 }
  0x3d   : > { %p2058_p10 = pnand %p2056_p8, %p2053_p5 }
  0x3f   : > { %2061 = shalt.err (!%p2058_p10)
}
  0x40   : > { %s2062_s8 = scalar_lea.vmem %s2300_s11, 1024  ;;  %p2070_p0 = scmp.lt.s32.totalorder %s2300_s11, %s2300_s11 }
  0x41   : > { %p2063_p11 = scmp.ne.s32.totalorder %s2300_s11, %s2062_s8  ;;  %p2071_p2 = scmp.lt.s32.totalorder %s2062_s8, %s2062_s8 }
  0x43   : > { %p2065_p12 = pnand %p2063_p11, %p2023_p9  ;;  %p2072_p3 = por %p2071_p2, %p2070_p0 }
  0x45   : > { %p2066_p13 = pneg %p2065_p12 }
  0x47   : > { %p2073_p6 = pnand %p2072_p3, %p2066_p13 }
  0x49   : > { %2076 = shalt.err (!%p2073_p6)
}
  0x4a   : > { %s2205_s19 = smov 64   ;;  %s2206_s7 = smov 4  }
  0x4b   : > { %1940 = dma.hbm_to_vmem [thread:$0]  (!%p2296_p7), %s3540_s4, 1024, %s2300_s11, [#allocation8], %s2205_s19, %s2205_s19, %s2206_s7  }
  0x4c   : > { %s35_s13 = sadd.s32 1, %s2195_s25  ;;  %s44_s14 = sadd.s32 1, %s2187_s23 }
  0x4d   : > { %p37_p9 = scmp.ge.s32.totalorder %s35_s13, 2  ;;  %p51_p1 = scmp.ne.s32.totalorder %s2187_s23, %s2183_s22 }
  0x4e   : > { %p52_p4 = scmp.eq.s32.totalorder %s2199_s26, 0  ;;  %p1950_p5 = scmp.lt.s32.totalorder %s2199_s26, 2 }
  0x4f   : > { %s3565_s13 = smov (%p37_p9, %s35_s13), 0  ;;  %s2361_s15 = sand.u32 1, %s2187_s23  }
  0x50   : > { %p53_p8 = por %p52_p4, %p51_p1  ;;  %s39_s9 = ssub.s32 %s2195_s25, %s3565_s13 }
  0x51   : > { %p42_p10 = scmp.eq.s32.totalorder %s39_s9, 0  ;;  %s1919_s16 = smul.u32 224, %s2361_s15 }
  0x52   : > { %s1805_s17 = sshll.u32 %s2195_s25, 12  ;;  %p2367_p11 = pnand %p1950_p5, %p53_p8 }
  0x53   : > { %s2372_s18 = scalar_select %p42_p10, %s2187_s23, %s44_s14  }
  0x54   : > { %s3542_s0 = sld [smem:[#allocation18_spill]]  ;;  %s265_s10 = scalar_lea.vmem [#allocation2], %s1919_s16 }
  0x55   : > { %s283_s12 = sshll.u32 %s265_s10, 4  ;;  %s2381_s9 = sadd.s32 3584, %s1805_s17  ;;  %s2379_s12 = int_to_ptr.vmem [resolvable:$true] %s283_s12 }
  0x56   : > { %s262_s27 = scalar_lea.sflag [#allocation3], %s2361_s15  ;;  %p2079_p12 = pneg %p2367_p11 }
  0x5a   : > { %s2377_s7 = scalar_lea.hbm %s3542_s0, %s1805_s17  ;;  %s2082_s19 = scalar_lea.hbm %s3542_s0, 8192 }
  0x5b   : > { %s2077_s20 = scalar_lea.hbm %s2377_s7, 3584  ;;  %p2083_p2 = scmp.lt.u32.totalorder %s2377_s7, %s3542_s0 }
  0x5c   : > { %p2078_p7 = scmp.ne.s32.totalorder %s2377_s7, %s2077_s20  ;;  %p2084_p3 = scmp.lt.u32.totalorder %s2082_s19, %s2077_s20 }
  0x5d   : > { %p2086_p9 = scmp.lt.u32.totalorder %s2077_s20, %s2377_s7 }
  0x5e   : > { %p2080_p13 = pnand %p2079_p12, %p2078_p7  ;;  %p2085_p6 = por %p2084_p3, %p2083_p2 }
  0x60   : > { %p2081_p0 = pneg %p2080_p13  ;;  %p2087_p1 = por %p2086_p9, %p2085_p6 }
  0x62   : > { %p2088_p4 = pnand %p2087_p1, %p2081_p0 }
  0x64   : > { %2091 = shalt.err (!%p2088_p4)
}
  0x65   : > { %s2092_s17 = scalar_lea.vmem %s2379_s12, 3584  ;;  %s2207_s10 = smov [#allocation2]  }
  0x66   : > { %p2093_p5 = scmp.ne.s32.totalorder %s2379_s12, %s2092_s17  ;;  %s2097_s14 = sshll.u32 %s2207_s10, 4  ;;  %s2098_s14 = int_to_ptr.vmem [resolvable:$false] %s2097_s14 }
  0x67   : > { %s2099_s21 = scalar_lea.vmem %s2098_s14, 7168  ;;  %p2100_p7 = scmp.lt.s32.totalorder %s2379_s12, %s2098_s14 }
  0x68   : > { %p2095_p8 = pnand %p2093_p5, %p2079_p12  ;;  %p2101_p13 = scmp.lt.s32.totalorder %s2099_s21, %s2092_s17 }
  0x6a   : > { %p2096_p10 = pneg %p2095_p8  ;;  %p2102_p2 = por %p2101_p13, %p2100_p7 }
  0x6c   : > { %p2103_p3 = pnand %p2102_p2, %p2096_p10 }
  0x6e   : > { %2106 = shalt.err (!%p2103_p3)
}
  0x6f   : > { %s3543_s20 = smov 8   ;;  %s3544_s8 = smov 128  }
  0x70   : > { %1944 = dma.hbm_to_vmem [thread:$0]  (!%p2367_p11), %s2377_s7, 3584, %s2379_s12, %s262_s27, %s3544_s8, %s3544_s8, %s3543_s20  }
  0x71   : > { %s293_s19 = sand.u32 1, %s2199_s26   ;;  %s2419_s10 = scalar_lea.hbm %s3511_s1, %s2381_s9 }
  0x72   : > { %s1756_s14 = sshll.u32 %s2361_s15, 5  ;;  %s2424_s2 = scalar_lea.sflag [#allocation5], %s293_s19 }
  0x73   : > { %s297_s21 = scalar_lea.vmem [#allocation4], %s1756_s14  ;;  %s2107_s4 = scalar_lea.hbm %s2419_s10, 512 }
  0x74   : > { %s311_s0 = sshll.u32 %s297_s21, 4  ;;  %p2108_p0 = scmp.ne.s32.totalorder %s2419_s10, %s2107_s4  ;;  %s2422_s0 = int_to_ptr.vmem [resolvable:$true] %s311_s0 }
  0x75   : > { %s2112_s12 = scalar_lea.hbm %s3511_s1, 8192  ;;  %p2113_p1 = scmp.lt.u32.totalorder %s2419_s10, %s3511_s1 }
  0x76   : > { %p2110_p6 = pnand %p2108_p0, %p2079_p12  ;;  %p2114_p4 = scmp.lt.u32.totalorder %s2112_s12, %s2107_s4 }
  0x77   : > { %p2116_p8 = scmp.lt.u32.totalorder %s2107_s4, %s2419_s10 }
  0x78   : > { %p2111_p9 = pneg %p2110_p6  ;;  %p2115_p5 = por %p2114_p4, %p2113_p1 }
  0x7a   : > { %p2117_p10 = por %p2116_p8, %p2115_p5 }
  0x7c   : > { %p2118_p7 = pnand %p2117_p10, %p2111_p9 }
  0x7e   : > { %2121 = shalt.err (!%p2118_p7)
}
  0x7f   : > { %s2122_s15 = scalar_lea.vmem %s2422_s0, 512  ;;  %s2208_s19 = smov [#allocation4]  }
  0x80   : > { %p2123_p13 = scmp.ne.s32.totalorder %s2422_s0, %s2122_s15  ;;  %s2127_s17 = sshll.u32 %s2208_s19, 4  ;;  %s2128_s17 = int_to_ptr.vmem [resolvable:$false] %s2127_s17 }
  0x81   : > { %s2129_s14 = scalar_lea.vmem %s2128_s17, 1024  ;;  %p2130_p0 = scmp.lt.s32.totalorder %s2422_s0, %s2128_s17 }
  0x82   : > { %p2125_p2 = pnand %p2123_p13, %p2079_p12  ;;  %p2131_p6 = scmp.lt.s32.totalorder %s2129_s14, %s2122_s15 }
  0x84   : > { %p2126_p3 = pneg %p2125_p2  ;;  %p2132_p1 = por %p2131_p6, %p2130_p0 }
  0x86   : > { %p2133_p4 = pnand %p2132_p1, %p2126_p3 }
  0x88   : > { %2136 = shalt.err (!%p2133_p4)
}
  0x89   : > { %1947 = dma.hbm_to_vmem [thread:$0]  (!%p2367_p11), %s2419_s10, 512, %s2422_s0, %s2424_s2, %s3544_s8, %s3544_s8, %s3543_s20  }
  0x8a   : > { %p3545_p12 = scmp.ne.s32.totalorder %s3537_s30, 0 }
  0x8c   : > { %323 = sbr.rel (%p3545_p12) target bundleno = 580 (0x244), region = 44 }
  0x93   : > { %s325_s4 = sand.u32 1, %s2183_s22   ;;  %p3546_p9 = scmp.ne.s32.totalorder %s3536_s29, 0 }
  0x94   : > { %s1920_s21 = smul.u32 224, %s325_s4  ;;  %s326_s27 = scalar_lea.sflag [#allocation3], %s325_s4 }
  0x96   : > { %s2456_s7 = scalar_lea.vmem [#allocation2], %s1920_s21 }
  0x97   : > { %2162 = dma.done.wait (%p3546_p9), %s326_s27, 3584  }
  0x98   : > { %2164 = vsyncadd (%p3546_p9), %s326_s27, 4294963712  ;;  %s3547_s11 = sadd.s32 4294967295, %s2199_s26   ;;  %s1760_s0 = sshll.u32 %s325_s4, 5 }
  0x99   : > { %s334_s12 = sand.u32 1, %s3547_s11   ;;  %s2464_s30 = scalar_lea.vmem [#allocation4], %s1760_s0 }
  0x9a   : > { %s335_s2 = scalar_lea.sflag [#allocation5], %s334_s12 }
  0x9b   : > { %2166 = dma.done.wait (%p3546_p9), %s335_s2, 512  }
  0x9c   : > { %2168 = vsyncadd (%p3546_p9), %s335_s2, 4294966784  ;;  %p3548_p11 = scmp.ne.s32.totalorder %s3535_s28, 0 }
  0x9e   : > { %2170 = dma.done.wait (%p3548_p11), [#allocation5], 256  }
  0x9f   : > { %2172 = vsyncadd (%p3548_p11), [#allocation5], 4294967040 }
  0xa0   : > { %2174 = dma.done.wait (%p3548_p11), [#allocation8], 1024  }
  0xa1   : > { %2176 = vsyncadd (%p3548_p11), [#allocation8], 4294966272  ;;  %v442_v0 = vlaneseq  ;;  %v2007_v1 = vld [vmem:[#allocation7] sm:$0xff]   ;;  %v2008_v2 = vld [vmem:[#allocation7 + $0x8] sm:$0xff]   ;;  %p397_p5 = scmp.lt.s32.totalorder %s2191_s24, 1 }
  0xa2   : > { %1859 = vmatprep.subr.bf16.mxu0 %v2007_v1  ;;  %1903 = vmatprep.subr.bf16.mxu1 %v2007_v1  ;;  %v2009_v4 = vld [vmem:[#allocation7 + $0x10] sm:$0xff]   ;;  %v2010_v8 = vld [vmem:[#allocation7 + $0x18] sm:$0xff]   ;;  %v2487_v11 = vld [vmem:[%s2456_s7 + $0x10] sm:$0xff] }
  0xa3   : > { %v2478_v3 = vshrl.u32 %v442_v0, 7  ;;  %1860 = vmatpush3.bf16.msra.mxu0 %v2007_v1  ;;  %1911 = vmatpush3.bf16.msra.mxu1 %v2007_v1  ;;  %v408_v9 = vld [vmem:[%s2456_s7] sm:$0xff]  ;;  %v409_v10 = vld [vmem:[%s2456_s7 + $0x8] sm:$0xff]  ;;  %v2493_v15 = vld [vmem:[%s2456_s7 + $0x18] sm:$0xff]  ;;  %v595_v19 = vrot.slane %v2487_v11, 1  ;;  %s3567_s24 = smov (!%p397_p5, %s2191_s24), 1 }
  0xa4   : > { %1861 = vmatprep.subr.bf16.mxu0 %v2008_v2  ;;  %1904 = vmatprep.subr.bf16.mxu1 %v2008_v2  ;;  %v2496_v16 = vld [vmem:[%s2456_s7 + $0x20] sm:$0xff]  ;;  %v2499_v17 = vld [vmem:[%s2456_s7 + $0x28] sm:$0xff]  ;;  %v594_v18 = vrot.slane %v408_v9, 1  ;;  %v610_v20 = vrot.slane %v409_v10, 1  ;;  %v611_v23 = vrot.slane %v2493_v15, 1  ;;  %v2519_v30 = vld [vmem:[%s2456_s7 + $0x30] sm:$0xff] }
  0xa5   : > { %v444_v5 = vsub.s32 0, %v2478_v3  ;;  %v476_v6 = vsub.s32 3, %v2478_v3  ;;  %v536_v7 = vsub.s32 6, %v2478_v3  ;;  %vm628_vm0 = vcmp.lt.s32.totalorder %v2478_v3, 7  ;;  %v2502_v21 = vld [vmem:[#allocation6] sm:$0xff]  ;;  %v2011_v31 = vld [vmem:[#allocation7 + $0x20] sm:$0xff]  }
  0xa6   : > { %v663_v12 = vsub.s32 1, %v2478_v3  ;;  %v723_v13 = vsub.s32 4, %v2478_v3  ;;  %v783_v14 = vsub.s32 7, %v2478_v3  ;;  %v596_v22 = vrot.slane %v2496_v16, 1  ;;  %v2012_v48 = vld [vmem:[#allocation7 + $0x28] sm:$0xff]   ;;  %v2013_v1 = vld [vmem:[#allocation7 + $0x30] sm:$0xff]  }
  0xa7   : > { %1862 = vmatpush3.bf16.msra.mxu0 %v2008_v2  ;;  %1912 = vmatpush3.bf16.msra.mxu1 %v2008_v2  ;;  %v612_v24 = vrot.slane %v2499_v17, 1  ;;  %v907_v25 = vsub.s32 2, %v2478_v3  ;;  %v2509_v26 = vrot.slane %v2502_v21, %v444_v5  ;;  %v2512_v27 = vrot.slane %v2502_v21, %v476_v6  ;;  %v2570_v2 = vld [vmem:[#allocation6 + $0x8] ss:$0 sm:$0xff]  ;;  %s1921_s16 = smul.u32 112, %s3567_s24 }
  0xa8   : > { %1863 = vmatprep.subr.bf16.mxu0 %v2009_v4  ;;  %1905 = vmatprep.subr.bf16.mxu1 %v2009_v4  ;;  %v2515_v28 = vrot.slane %v2502_v21, %v536_v7  ;;  %v967_v29 = vsub.s32 5, %v2478_v3  ;;  %v629_v32 = vsel %vm628_vm0, %v594_v18, %v610_v20  ;;  %v630_v33 = vsel %vm628_vm0, %v595_v19, %v611_v23 }
  0xa9   : > { %v2527_v34 = vsel %vm628_vm0, %v596_v22, %v612_v24  ;;  %v597_v35 = vrot.slane %v2519_v30, 1  ;;  %v446_v36 = vmul.f32 %v2509_v26, %v408_v9  ;;  %v447_v37 = vmul.f32 %v2509_v26, %v409_v10  ;;  %s3438_s17 = scalar_lea.vmem %s3516_s6, %s1921_s16 }
  0xaa   : > { %v478_v38 = vmul.f32 %v2512_v27, %v2487_v11  ;;  %v479_v39 = vmul.f32 %v2512_v27, %v2493_v15  ;;  %v538_v40 = vmul.f32 %v2515_v28, %v2496_v16  ;;  %v539_v41 = vmul.f32 %v2515_v28, %v2499_v17 }
  0xab   : > { %1864 = vmatpush3.bf16.msra.mxu0 %v2009_v4  ;;  %1913 = vmatpush3.bf16.msra.mxu1 %v2009_v4  ;;  %v645_v42 = vsel %vm628_vm0, %v610_v20, %v594_v18  ;;  %v646_v43 = vsel %vm628_vm0, %v611_v23, %v595_v19  ;;  %v2546_v46 = vsel %vm628_vm0, %v612_v24, %v596_v22  ;;  %v841_v47 = vrot.slane %v629_v32, 1  ;;  %v2591_v22 = vld [vmem:[%s2456_s7 + $0x38] sm:$0xff] }
  0xac   : > { %1865 = vmatprep.subr.bf16.mxu0 %v2010_v8  ;;  %1906 = vmatprep.subr.bf16.mxu1 %v2010_v8  ;;  %v506_v44 = vadd.f32 %v478_v38, %v446_v36  ;;  %v507_v45 = vadd.f32 %v479_v39, %v447_v37  ;;  %v2549_v49 = vrot.slane %v2502_v21, %v663_v12  ;;  %v842_v52 = vrot.slane %v630_v33, 1 }
  0xad   : > { %v2552_v50 = vrot.slane %v2502_v21, %v723_v13  ;;  %v2555_v51 = vrot.slane %v2502_v21, %v783_v14  ;;  %v843_v55 = vrot.slane %v2527_v34, 1  ;;  %v857_v56 = vrot.slane %v645_v42, 1  ;;  %v2584_v13 = vld [vmem:[%s2456_s7 + $0x80] sm:$0xff] }
  0xae   : > { %v566_v53 = vadd.f32 %v538_v40, %v506_v44  ;;  %v567_v54 = vadd.f32 %v539_v41, %v507_v45  ;;  %v665_v57 = vmul.f32 %v2549_v49, %v629_v32  ;;  %v666_v58 = vmul.f32 %v2549_v49, %v645_v42  ;;  %v2624_v45 = vld [vmem:[%s2456_s7 + $0x90] sm:$0xff] }
  0xaf   : > { %1866 = vmatpush3.bf16.msra.mxu0 %v2010_v8  ;;  %1914 = vmatpush3.bf16.msra.mxu1 %v2010_v8  ;;  %v2561_v59 = vmul.f32 %v2549_v49, %v630_v33  ;;  %v2564_v60 = vmul.f32 %v2549_v49, %v646_v43  ;;  %v725_v61 = vmul.f32 %v2552_v50, %v630_v33  ;;  %v858_v0 = vrot.slane %v646_v43, 1  ;;  %v2014_v33 = vld [vmem:[#allocation7 + $0x38] sm:$0xff]  }
  0xb0   : > { %1867 = vmatprep.subr.bf16.mxu0 %v2011_v31  ;;  %1907 = vmatprep.subr.bf16.mxu1 %v2011_v31  ;;  %v726_v62 = vmul.f32 %v2552_v50, %v646_v43  ;;  %v785_v63 = vmul.f32 %v2555_v51, %v2527_v34  ;;  %v693_v4 = vadd.f32 %v665_v57, %v566_v53  ;;  %v859_v7 = vrot.slane %v2546_v46, 1 }
  0xb1   : > { %v694_v5 = vadd.f32 %v666_v58, %v567_v54  ;;  %v786_v6 = vmul.f32 %v2555_v51, %v2546_v46  ;;  %v873_v8 = vsel %vm628_vm0, %v841_v47, %v857_v56  ;;  %v874_v9 = vsel %vm628_vm0, %v842_v52, %v858_v0 }
  0xb2   : > { %v889_v10 = vsel %vm628_vm0, %v857_v56, %v841_v47  ;;  %v890_v12 = vsel %vm628_vm0, %v858_v0, %v842_v52  ;;  %v753_v14 = vadd.f32 %v725_v61, %v693_v4  ;;  %v875_v19 = vsel %vm628_vm0, %v843_v55, %v859_v7 }
  0xb3   : > { %1868 = vmatpush3.bf16.msra.mxu0 %v2011_v31  ;;  %1915 = vmatpush3.bf16.msra.mxu1 %v2011_v31  ;;  %v754_v18 = vadd.f32 %v726_v62, %v694_v5  ;;  %v891_v20 = vsel %vm628_vm0, %v859_v7, %v843_v55  ;;  %v2596_v23 = vrot.slane %v2502_v21, %v907_v25  ;;  %v613_v32 = vrot.slane %v2591_v22, 1 }
  0xb4   : > { %1869 = vmatprep.subr.bf16.mxu0 %v2012_v48  ;;  %1908 = vmatprep.subr.bf16.mxu1 %v2012_v48  ;;  %v2601_v24 = vrot.slane %v2502_v21, %v967_v29  ;;  %v1029_v31 = vmul.f32 %v2570_v2, %v875_v19  ;;  %v813_v36 = vadd.f32 %v785_v63, %v753_v14  ;;  %v602_v25 = vrot.slane %v2584_v13, 1 }
  0xb5   : > { %v814_v37 = vadd.f32 %v786_v6, %v754_v18  ;;  %v1030_v38 = vmul.f32 %v2570_v2, %v891_v20  ;;  %v909_v39 = vmul.f32 %v2596_v23, %v873_v8  ;;  %v910_v40 = vmul.f32 %v2596_v23, %v889_v10 }
  0xb6   : > { %v2610_v21 = vmul.f32 %v2596_v23, %v874_v9  ;;  %v2613_v29 = vmul.f32 %v2596_v23, %v890_v12  ;;  %v2616_v41 = vmul.f32 %v2596_v23, %v875_v19  ;;  %v2619_v42 = vmul.f32 %v2596_v23, %v891_v20 }
  0xb7   : > { %1870 = vmatpush3.bf16.msra.mxu0 %v2012_v48  ;;  %1916 = vmatpush3.bf16.msra.mxu1 %v2012_v48  ;;  %v969_v43 = vmul.f32 %v2601_v24, %v874_v9  ;;  %v970_v44 = vmul.f32 %v2601_v24, %v890_v12  ;;  %v937_v47 = vadd.f32 %v909_v39, %v813_v36  ;;  %v603_v53 = vrot.slane %v2624_v45, 1  ;;  %v425_v9 = vld [vmem:[%s2456_s7 + $0x88] sm:$0xff] }
  0xb8   : > { %1871 = vmatprep.subr.bf16.mxu0 %v2013_v1  ;;  %1909 = vmatprep.subr.bf16.mxu1 %v2013_v1  ;;  %v938_v48 = vadd.f32 %v910_v40, %v814_v37  ;;  %v2627_v52 = vmul.f32 %v2601_v24, %v875_v19  ;;  %v2631_v54 = vmul.f32 %v2601_v24, %v891_v20 }
  0xb9   : > { %v448_v55 = vmul.f32 %v2509_v26, %v2487_v11  ;;  %v449_v56 = vmul.f32 %v2509_v26, %v2493_v15  ;;  %v480_v57 = vmul.f32 %v2512_v27, %v2496_v16  ;;  %v997_v58 = vadd.f32 %v969_v43, %v937_v47  ;;  %v2646_v11 = vld [vmem:[%s3513_s3] ss:$0 sm:$0xff] }
  0xba   : > { %v998_v61 = vadd.f32 %v970_v44, %v938_v48  ;;  %v481_v62 = vmul.f32 %v2512_v27, %v2499_v17  ;;  %v540_v63 = vmul.f32 %v2515_v28, %v2519_v30  ;;  %v541_v15 = vmul.f32 %v2515_v28, %v2591_v22 }
  0xbb   : > { %1872 = vmatpush3.bf16.msra.mxu0 %v2013_v1  ;;  %1917 = vmatpush3.bf16.msra.mxu1 %v2013_v1  ;;  %v508_v0 = vadd.f32 %v480_v57, %v448_v55  ;;  %v2654_v1 = vsel %vm628_vm0, %v597_v35, %v613_v32  ;;  %v2660_v4 = vsel %vm628_vm0, %v613_v32, %v597_v35  ;;  %v2675_v32 = vld [vmem:[%s2456_s7 + $0x98] sm:$0xff]  ;;  %v2694_v55 = vld [vmem:[%s2456_s7 + $0xa0] sm:$0xff] }
  0xbc   : > { %1873 = vmatprep.subr.bf16.mxu0 %v2014_v33  ;;  %1910 = vmatprep.subr.bf16.mxu1 %v2014_v33  ;;  %v1057_v5 = vadd.f32 %v1029_v31, %v997_v58  ;;  %v1058_v6 = vadd.f32 %v1030_v38, %v998_v61  ;;  %v509_v7 = vadd.f32 %v481_v62, %v449_v56  ;;  %v844_v31 = vrot.slane %v2654_v1, 1  ;;  %v2697_v56 = vld [vmem:[%s2456_s7 + $0xa8] sm:$0xff] }
  0xbd   : > { %v727_v8 = vmul.f32 %v2552_v50, %v2527_v34  ;;  %v568_v10 = vadd.f32 %v540_v63, %v508_v0  ;;  %v728_v12 = vmul.f32 %v2552_v50, %v2546_v46  ;;  %v787_v14 = vmul.f32 %v2555_v51, %v2654_v1 }
  0xbe   : > { %v788_v35 = vmul.f32 %v2555_v51, %v2660_v4  ;;  %v1092_v18 = vadd.f32 %v2646_v11, %v1057_v5  ;;  %v1093_v19 = vadd.f32 %v2646_v11, %v1058_v6  ;;  %v569_v20 = vadd.f32 %v541_v15, %v509_v7 }
  0xbf   : > { %1874 = vmatpush3.bf16.msra.mxu0 %v2014_v33  ;;  %1918 = vmatpush3.bf16.msra.mxu1 %v2014_v33  ;;  %v695_v36 = vadd.f32 %v2561_v59, %v568_v10  ;;  %v860_v37 = vrot.slane %v2660_v4, 1  ;;  %v462_v38 = vmul.f32 %v2509_v26, %v2584_v13  ;;  %v463_v33 = vmul.f32 %v2509_v26, %v425_v9 }
  0xc0   : > { %v1120_v39 = vmax.f32 %v1092_v18, 0.0  ;;  %v1121_v40 = vmax.f32 %v1093_v19, 0.0  ;;  %v696_v43 = vadd.f32 %v2564_v60, %v569_v20  ;;  %v494_v44 = vmul.f32 %v2512_v27, %v2624_v45 }
  0xc1   : > { %v755_v47 = vadd.f32 %v727_v8, %v695_v36  ;;  %v2687_v48 = vsel %vm628_vm0, %v844_v31, %v860_v37  ;;  %v2691_v59 = vsel %vm628_vm0, %v860_v37, %v844_v31  ;;  %v495_v57 = vmul.f32 %v2512_v27, %v2675_v32 }
  0xc2   : > { %v1148_v60 = vmin.f32 %v1120_v39, 6.0  ;;  %v1149_v58 = vmin.f32 %v1121_v40, 6.0  ;;  %v756_v61 = vadd.f32 %v728_v12, %v696_v43  ;;  %v1031_v62 = vmul.f32 %v2570_v2, %v2687_v48 }
  0xc3   : > { %v815_v63 = vadd.f32 %v787_v14, %v755_v47  ;;  %v1032_v0 = vmul.f32 %v2570_v2, %v2691_v59  ;;  %v522_v15 = vadd.f32 %v494_v44, %v462_v38  ;;  %v523_v5 = vadd.f32 %v495_v57, %v463_v33 }
  0xc4   : > { %v1176_v6 = vpack.c.bf16 %v1149_v58, %v1148_v60  ;;  %v816_v7 = vadd.f32 %v788_v35, %v756_v61  ;;  %v554_v8 = vmul.f32 %v2515_v28, %v2694_v55  ;;  %v555_v10 = vmul.f32 %v2515_v28, %v2697_v56 }
  0xc5   : > { %v939_v18 = vadd.f32 %v2610_v21, %v815_v63  ;;  %v604_v12 = vrot.slane %v2694_v55, 1  ;;  %v618_v19 = vrot.slane %v425_v9, 1  ;;  %v619_v14 = vrot.slane %v2675_v32, 1 }
  0xc6   : > { %1875 = vmatprep.mubr.bf16.mxu0 %v1176_v6  ;;  %v940_v20 = vadd.f32 %v2613_v29, %v816_v7  ;;  %v582_v31 = vadd.f32 %v554_v8, %v522_v15  ;;  %v583_v36 = vadd.f32 %v555_v10, %v523_v5  ;;  %v620_v35 = vrot.slane %v2697_v56, 1 }
  0xc7   : > { %v999_v37 = vadd.f32 %v2627_v52, %v939_v18  ;;  %v2719_v38 = vsel %vm628_vm0, %v602_v25, %v618_v19  ;;  %v2725_v21 = vsel %vm628_vm0, %v603_v53, %v619_v14  ;;  %v2731_v29 = vsel %vm628_vm0, %v618_v19, %v602_v25 }
  0xc8   : > { %3549 = vst [vmem:[#allocation13_spill] sm:$0xff] %v2725_v21  ;;  %v1000_v52 = vadd.f32 %v2631_v54, %v940_v20  ;;  %v2736_v9 = vsel %vm628_vm0, %v604_v12, %v620_v35  ;;  %v2742_v33 = vsel %vm628_vm0, %v619_v14, %v603_v53  ;;  %v2746_v39 = vsel %vm628_vm0, %v620_v35, %v604_v12 }
  0xc9   : > { %3550 = vst [vmem:[#allocation14_spill] sm:$0xff] %v2742_v33  ;;  %v1059_v13 = vadd.f32 %v1031_v62, %v999_v37  ;;  %v681_v25 = vmul.f32 %v2549_v49, %v2719_v38  ;;  %v682_v54 = vmul.f32 %v2549_v49, %v2731_v29  ;;  %v741_v40 = vmul.f32 %v2552_v50, %v2725_v21 }
  0xca   : > { %v1060_v43 = vadd.f32 %v1032_v0, %v1000_v52  ;;  %v742_v44 = vmul.f32 %v2552_v50, %v2742_v33  ;;  %v801_v53 = vmul.f32 %v2555_v51, %v2736_v9  ;;  %v802_v47 = vmul.f32 %v2555_v51, %v2746_v39 }
  0xcb   : > { %v1094_v57 = vadd.f32 %v2646_v11, %v1059_v13  ;;  %v709_v60 = vadd.f32 %v681_v25, %v582_v31  ;;  %v710_v58 = vadd.f32 %v682_v54, %v583_v36  ;;  %v849_v61 = vrot.slane %v2719_v38, 1 }
  0xcc   : > { %v1095_v62 = vadd.f32 %v2646_v11, %v1060_v43  ;;  %v850_v63 = vrot.slane %v2725_v21, 1  ;;  %v851_v0 = vrot.slane %v2736_v9, 1  ;;  %v865_v15 = vrot.slane %v2731_v29, 1 }
  0xcd   : > { %v1122_v5 = vmax.f32 %v1094_v57, 0.0  ;;  %v769_v6 = vadd.f32 %v741_v40, %v709_v60  ;;  %v770_v7 = vadd.f32 %v742_v44, %v710_v58  ;;  %v866_v8 = vrot.slane %v2742_v33, 1 }
  0xce   : > { %v1123_v10 = vmax.f32 %v1095_v62, 0.0  ;;  %v867_v18 = vrot.slane %v2746_v39, 1  ;;  %v2770_v12 = vsel %vm628_vm0, %v849_v61, %v865_v15  ;;  %v2774_v19 = vsel %vm628_vm0, %v865_v15, %v849_v61 }
  0xcf   : > { %3551 = vst [vmem:[#allocation15_spill] sm:$0xff] %v2774_v19  ;;  %v1150_v14 = vmin.f32 %v1122_v5, 6.0  ;;  %v829_v20 = vadd.f32 %v801_v53, %v769_v6  ;;  %v830_v31 = vadd.f32 %v802_v47, %v770_v7  ;;  %v2778_v36 = vsel %vm628_vm0, %v850_v63, %v866_v8 }
  0xd0   : > { %3552 = vst [vmem:[#allocation16_spill] sm:$0xff] %v2778_v36  ;;  %v1151_v35 = vmin.f32 %v1123_v10, 6.0  ;;  %v883_v37 = vsel %vm628_vm0, %v851_v0, %v867_v18  ;;  %v2784_v52 = vsel %vm628_vm0, %v866_v8, %v850_v63  ;;  %v899_v13 = vsel %vm628_vm0, %v867_v18, %v851_v0  ;;  %v2814_v63 = vld [vmem:[%s2456_s7 + $0xb0] sm:$0xff]  ;;  %v2817_v0 = vld [vmem:[%s2456_s7 + $0xb8] sm:$0xff] }
  0xd1   : > { %3553 = vst [vmem:[#allocation17_spill] sm:$0xff] %v2784_v52  ;;  %v925_v25 = vmul.f32 %v2596_v23, %v2770_v12  ;;  %v926_v54 = vmul.f32 %v2596_v23, %v2774_v19  ;;  %v2794_v40 = vmul.f32 %v2596_v23, %v2778_v36  ;;  %v2798_v43 = vmul.f32 %v2596_v23, %v2784_v52 }
  0xd2   : > { %v1177_v44 = vpack.c.bf16 %v1151_v35, %v1150_v14  ;;  %v2801_v53 = vmul.f32 %v2596_v23, %v883_v37  ;;  %v2804_v47 = vmul.f32 %v2596_v23, %v899_v13  ;;  %v985_v57 = vmul.f32 %v2601_v24, %v2778_v36  ;;  %v2865_v36 = vld [vmem:[%s2456_s7 + $0x40] sm:$0xff] }
  0xd3   : > { %v953_v60 = vadd.f32 %v925_v25, %v829_v20  ;;  %v954_v58 = vadd.f32 %v926_v54, %v830_v31  ;;  %v986_v61 = vmul.f32 %v2601_v24, %v2784_v52  ;;  %v2811_v62 = vmul.f32 %v2601_v24, %v883_v37 }
  0xd4   : > { %1876 = vmatmul.mubr.bf16.vlgmr.msra.gmra.mrb[0].mxu0 %v1177_v44  ;;  %v2820_v15 = vmul.f32 %v2601_v24, %v899_v13  ;;  %v1045_v5 = vmul.f32 %v2570_v2, %v883_v37  ;;  %v1046_v6 = vmul.f32 %v2570_v2, %v899_v13  ;;  %v464_v7 = vmul.f32 %v2509_v26, %v2624_v45 }
  0xd5   : > { %v1013_v8 = vadd.f32 %v985_v57, %v953_v60  ;;  %v1014_v10 = vadd.f32 %v986_v61, %v954_v58  ;;  %v465_v18 = vmul.f32 %v2509_v26, %v2675_v32  ;;  %v496_v14 = vmul.f32 %v2512_v27, %v2694_v55 }
  0xd6   : > { %v497_v20 = vmul.f32 %v2512_v27, %v2697_v56  ;;  %v556_v31 = vmul.f32 %v2515_v28, %v2814_v63  ;;  %v557_v35 = vmul.f32 %v2515_v28, %v2817_v0  ;;  %v605_v37 = vrot.slane %v2814_v63, 1 }
  0xd7   : > { %v1073_v45 = vadd.f32 %v1045_v5, %v1013_v8  ;;  %v1074_v13 = vadd.f32 %v1046_v6, %v1014_v10  ;;  %v524_v25 = vadd.f32 %v496_v14, %v464_v7  ;;  %v621_v54 = vrot.slane %v2817_v0, 1 }
  0xd8   : > { %v525_v32 = vadd.f32 %v497_v20, %v465_v18  ;;  %v683_v44 = vmul.f32 %v2549_v49, %v2725_v21  ;;  %v684_v57 = vmul.f32 %v2549_v49, %v2742_v33  ;;  %v743_v60 = vmul.f32 %v2552_v50, %v2736_v9 }
  0xd9   : > { %v1108_v58 = vadd.f32 %v2646_v11, %v1073_v45  ;;  %v1109_v61 = vadd.f32 %v2646_v11, %v1074_v13  ;;  %v584_v52 = vadd.f32 %v556_v31, %v524_v25  ;;  %v2848_v5 = vsel %vm628_vm0, %v605_v37, %v621_v54 }
  0xda   : > { %v585_v6 = vadd.f32 %v557_v35, %v525_v32  ;;  %v2852_v7 = vsel %vm628_vm0, %v621_v54, %v605_v37  ;;  %v744_v8 = vmul.f32 %v2552_v50, %v2746_v39  ;;  %v803_v10 = vmul.f32 %v2555_v51, %v2848_v5 }
  0xdb   : > { %v1136_v18 = vmax.f32 %v1108_v58, 0.0  ;;  %v1137_v14 = vmax.f32 %v1109_v61, 0.0  ;;  %v711_v20 = vadd.f32 %v683_v44, %v584_v52  ;;  %v804_v31 = vmul.f32 %v2555_v51, %v2852_v7  ;;  %v2878_v61 = vld [vmem:[%s2456_s7 + $0x48] sm:$0xff] }
  0xdc   : > { %v712_v45 = vadd.f32 %v684_v57, %v585_v6  ;;  %v852_v35 = vrot.slane %v2848_v5, 1  ;;  %v868_v13 = vrot.slane %v2852_v7, 1  ;;  %v450_v37 = vmul.f32 %v2509_v26, %v2496_v16 }
  0xdd   : > { %v1164_v25 = vmin.f32 %v1136_v18, 6.0  ;;  %v1165_v54 = vmin.f32 %v1137_v14, 6.0  ;;  %v771_v32 = vadd.f32 %v743_v60, %v711_v20  ;;  %v451_v58 = vmul.f32 %v2509_v26, %v2499_v17 }
  0xde   : > { %v772_v52 = vadd.f32 %v744_v8, %v712_v45  ;;  %v2871_v44 = vsel %vm628_vm0, %v852_v35, %v868_v13  ;;  %v2875_v57 = vsel %vm628_vm0, %v868_v13, %v852_v35  ;;  %v482_v16 = vmul.f32 %v2512_v27, %v2519_v30 }
  0xdf   : > { %v1184_v60 = vpack.c.bf16 %v1165_v54, %v1164_v25  ;;  %v831_v6 = vadd.f32 %v803_v10, %v771_v32  ;;  %v1047_v18 = vmul.f32 %v2570_v2, %v2871_v44  ;;  %v1048_v17 = vmul.f32 %v2570_v2, %v2875_v57 }
  0xe0   : > { %v832_v8 = vadd.f32 %v804_v31, %v772_v52  ;;  %v483_v14 = vmul.f32 %v2512_v27, %v2591_v22  ;;  %v510_v20 = vadd.f32 %v482_v16, %v450_v37  ;;  %v542_v45 = vmul.f32 %v2515_v28, %v2865_v36 }
  0xe1   : > { %1891 = vmatprep.mubr.bf16.mxu1 %v1184_v60  ;;  %v955_v35 = vadd.f32 %v2794_v40, %v831_v6  ;;  %v543_v10 = vmul.f32 %v2515_v28, %v2878_v61  ;;  %v598_v13 = vrot.slane %v2865_v36, 1  ;;  %v614_v25 = vrot.slane %v2878_v61, 1 }
  0xe2   : > { %v956_v54 = vadd.f32 %v2798_v43, %v832_v8  ;;  %v511_v31 = vadd.f32 %v483_v14, %v451_v58  ;;  %v570_v32 = vadd.f32 %v542_v45, %v510_v20  ;;  %v669_v37 = vmul.f32 %v2549_v49, %v2527_v34 }
  0xe3   : > { %v1015_v52 = vadd.f32 %v2811_v62, %v955_v35  ;;  %v2901_v16 = vsel %vm628_vm0, %v598_v13, %v614_v25  ;;  %v2905_v40 = vsel %vm628_vm0, %v614_v25, %v598_v13  ;;  %v670_v60 = vmul.f32 %v2549_v49, %v2546_v46 }
  0xe4   : > { %v1016_v43 = vadd.f32 %v2820_v15, %v956_v54  ;;  %v571_v58 = vadd.f32 %v543_v10, %v511_v31  ;;  %v697_v6 = vadd.f32 %v669_v37, %v570_v32  ;;  %v729_v34 = vmul.f32 %v2552_v50, %v2654_v1 }
  0xe5   : > { %v1075_v8 = vadd.f32 %v1047_v18, %v1015_v52  ;;  %v730_v62 = vmul.f32 %v2552_v50, %v2660_v4  ;;  %v789_v14 = vmul.f32 %v2555_v51, %v2901_v16  ;;  %v790_v20 = vmul.f32 %v2555_v51, %v2905_v40 }
  0xe6   : > { %v1076_v45 = vadd.f32 %v1048_v17, %v1016_v43  ;;  %v698_v46 = vadd.f32 %v670_v60, %v571_v58  ;;  %v757_v35 = vadd.f32 %v729_v34, %v697_v6  ;;  %v845_v15 = vrot.slane %v2901_v16, 1  ;;  %v2937_v43 = vld [vmem:[%s2456_s7 + $0x50] sm:$0xff] }
  0xe7   : > { %v1110_v10 = vadd.f32 %v2646_v11, %v1075_v8  ;;  %v861_v13 = vrot.slane %v2905_v40, 1  ;;  %v973_v18 = vmul.f32 %v2601_v24, %v2687_v48  ;;  %v974_v25 = vmul.f32 %v2601_v24, %v2691_v59 }
  0xe8   : > { %v1111_v54 = vadd.f32 %v2646_v11, %v1076_v45  ;;  %v758_v31 = vadd.f32 %v730_v62, %v698_v46  ;;  %v817_v32 = vadd.f32 %v789_v14, %v757_v35  ;;  %v452_v17 = vmul.f32 %v2509_v26, %v2519_v30  ;;  %v2945_v62 = vld [vmem:[%s2456_s7 + $0x58] sm:$0xff] }
  0xe9   : > { %v1138_v37 = vmax.f32 %v1110_v10, 0.0  ;;  %v2930_v52 = vsel %vm628_vm0, %v845_v15, %v861_v13  ;;  %v2934_v60 = vsel %vm628_vm0, %v861_v13, %v845_v15  ;;  %v453_v58 = vmul.f32 %v2509_v26, %v2591_v22 }
  0xea   : > { %v1139_v6 = vmax.f32 %v1111_v54, 0.0  ;;  %v818_v34 = vadd.f32 %v790_v20, %v758_v31  ;;  %v941_v8 = vadd.f32 %v2616_v41, %v817_v32  ;;  %v1033_v30 = vmul.f32 %v2570_v2, %v2930_v52 }
  0xeb   : > { %v1166_v14 = vmin.f32 %v1138_v37, 6.0  ;;  %v1034_v45 = vmul.f32 %v2570_v2, %v2934_v60  ;;  %v484_v46 = vmul.f32 %v2512_v27, %v2865_v36  ;;  %v485_v35 = vmul.f32 %v2512_v27, %v2878_v61 }
  0xec   : > { %v1167_v22 = vmin.f32 %v1139_v6, 6.0  ;;  %v942_v20 = vadd.f32 %v2619_v42, %v818_v34  ;;  %v1001_v15 = vadd.f32 %v973_v18, %v941_v8  ;;  %v544_v41 = vmul.f32 %v2515_v28, %v2937_v43 }
  0xed   : > { %v512_v10 = vadd.f32 %v484_v46, %v452_v17  ;;  %v513_v13 = vadd.f32 %v485_v35, %v453_v58  ;;  %v545_v54 = vmul.f32 %v2515_v28, %v2945_v62  ;;  %v599_v31 = vrot.slane %v2937_v43, 1 }
  0xee   : > { %v1185_v32 = vpack.c.bf16 %v1167_v22, %v1166_v14  ;;  %v1002_v37 = vadd.f32 %v974_v25, %v942_v20  ;;  %v1061_v33 = vadd.f32 %v1033_v30, %v1001_v15  ;;  %v615_v21 = vrot.slane %v2945_v62, 1 }
  0xef   : > { %v572_v19 = vadd.f32 %v544_v41, %v512_v10  ;;  %v573_v6 = vadd.f32 %v545_v54, %v513_v13  ;;  %v671_v42 = vmul.f32 %v2549_v49, %v2654_v1  ;;  %v672_v18 = vmul.f32 %v2549_v49, %v2660_v4 }
  0xf0   : > { %1892 = vmatmul.mubr.bf16.vlgmr.msra.gmra.mrb[0].mxu1 %v1185_v32  ;;  %v1062_v17 = vadd.f32 %v1034_v45, %v1002_v37  ;;  %v1096_v58 = vadd.f32 %v2646_v11, %v1061_v33  ;;  %v2967_v34 = vsel %vm628_vm0, %v599_v31, %v615_v21  ;;  %v2971_v25 = vsel %vm628_vm0, %v615_v21, %v599_v31 }
  0xf1   : > { %v699_v8 = vadd.f32 %v671_v42, %v572_v19  ;;  %v700_v30 = vadd.f32 %v672_v18, %v573_v6  ;;  %v731_v1 = vmul.f32 %v2552_v50, %v2901_v16  ;;  %v732_v4 = vmul.f32 %v2552_v50, %v2905_v40  ;;  %v3003_v42 = vld [vmem:[%s2456_s7 + $0xc0] sm:$0xff]  ;;  %v3006_v18 = vld [vmem:[%s2456_s7 + $0xc8] sm:$0xff] }
  0xf2   : > { %v1097_v14 = vadd.f32 %v2646_v11, %v1062_v17  ;;  %v1124_v45 = vmax.f32 %v1096_v58, 0.0  ;;  %v791_v33 = vmul.f32 %v2555_v51, %v2967_v34  ;;  %v792_v46 = vmul.f32 %v2555_v51, %v2971_v25 }
  0xf3   : > { %v759_v35 = vadd.f32 %v731_v1, %v699_v8  ;;  %v760_v21 = vadd.f32 %v732_v4, %v700_v30  ;;  %v846_v19 = vrot.slane %v2967_v34, 1  ;;  %v862_v22 = vrot.slane %v2971_v25, 1 }
  0xf4   : > { %v1125_v20 = vmax.f32 %v1097_v14, 0.0  ;;  %v1152_v15 = vmin.f32 %v1124_v45, 6.0  ;;  %v915_v41 = vmul.f32 %v2596_v23, %v2687_v48  ;;  %v916_v10 = vmul.f32 %v2596_v23, %v2691_v59 }
  0xf5   : > { %v819_v13 = vadd.f32 %v791_v33, %v759_v35  ;;  %v820_v54 = vadd.f32 %v792_v46, %v760_v21  ;;  %v2990_v31 = vsel %vm628_vm0, %v846_v19, %v862_v22  ;;  %v2994_v32 = vsel %vm628_vm0, %v862_v22, %v846_v19 }
  0xf6   : > { %v1153_v37 = vmin.f32 %v1125_v20, 6.0  ;;  %v975_v6 = vmul.f32 %v2601_v24, %v2930_v52  ;;  %v976_v48 = vmul.f32 %v2601_v24, %v2934_v60  ;;  %v1035_v59 = vmul.f32 %v2570_v2, %v2990_v31 }
  0xf7   : > { %v943_v17 = vadd.f32 %v915_v41, %v819_v13  ;;  %v944_v58 = vadd.f32 %v916_v10, %v820_v54  ;;  %v1036_v8 = vmul.f32 %v2570_v2, %v2994_v32  ;;  %v466_v30 = vmul.f32 %v2509_v26, %v2694_v55 }
  0xf8   : > { %v1178_v1 = vpack.c.bf16 %v1153_v37, %v1152_v15  ;;  %v467_v4 = vmul.f32 %v2509_v26, %v2697_v56  ;;  %v498_v14 = vmul.f32 %v2512_v27, %v2814_v63  ;;  %v499_v45 = vmul.f32 %v2512_v27, %v2817_v0 }
  0xf9   : > { %v1003_v33 = vadd.f32 %v975_v6, %v943_v17  ;;  %v1004_v46 = vadd.f32 %v976_v48, %v944_v58  ;;  %v558_v35 = vmul.f32 %v2515_v28, %v3003_v42  ;;  %v559_v21 = vmul.f32 %v2515_v28, %v3006_v18 }
  0xfa   : > { %1879 = vmatprep.mubr.bf16.mxu0 %v1178_v1  ;;  %v526_v55 = vadd.f32 %v498_v14, %v466_v30  ;;  %v527_v19 = vadd.f32 %v499_v45, %v467_v4  ;;  %v606_v22 = vrot.slane %v3003_v42, 1  ;;  %v622_v56 = vrot.slane %v3006_v18, 1 }
  0xfb   : > { %v1063_v20 = vadd.f32 %v1035_v59, %v1003_v33  ;;  %v1064_v15 = vadd.f32 %v1036_v8, %v1004_v46  ;;  %v685_v41 = vmul.f32 %v2549_v49, %v2736_v9  ;;  %v686_v10 = vmul.f32 %v2549_v49, %v2746_v39 }
  0xfc   : > { %v586_v13 = vadd.f32 %v558_v35, %v526_v55  ;;  %v587_v54 = vadd.f32 %v559_v21, %v527_v19  ;;  %v3030_v37 = vsel %vm628_vm0, %v606_v22, %v622_v56  ;;  %v3034_v6 = vsel %vm628_vm0, %v622_v56, %v606_v22 }
  0xfd   : > { %v1098_v48 = vadd.f32 %v2646_v11, %v1063_v20  ;;  %v1099_v59 = vadd.f32 %v2646_v11, %v1064_v15  ;;  %v745_v9 = vmul.f32 %v2552_v50, %v2848_v5  ;;  %v746_v39 = vmul.f32 %v2552_v50, %v2852_v7  ;;  %v3061_v20 = vld [vmem:[%s2456_s7 + $0xd0] sm:$0xff] }
  0xfe   : > { %v713_v17 = vadd.f32 %v685_v41, %v586_v13  ;;  %v714_v58 = vadd.f32 %v686_v10, %v587_v54  ;;  %v805_v8 = vmul.f32 %v2555_v51, %v3030_v37  ;;  %v806_v30 = vmul.f32 %v2555_v51, %v3034_v6  ;;  %v3068_v54 = vld [vmem:[%s2456_s7 + $0xd8] sm:$0xff] }
  0xff   : > { %v1126_v1 = vmax.f32 %v1098_v48, 0.0  ;;  %v1127_v4 = vmax.f32 %v1099_v59, 0.0  ;;  %v853_v14 = vrot.slane %v3030_v37, 1  ;;  %v869_v45 = vrot.slane %v3034_v6, 1 }
 0x100   : > { %v773_v33 = vadd.f32 %v745_v9, %v713_v17  ;;  %v774_v46 = vadd.f32 %v746_v39, %v714_v58  ;;  %v989_v35 = vmul.f32 %v2601_v24, %v2871_v44  ;;  %v990_v21 = vmul.f32 %v2601_v24, %v2875_v57 }
 0x101   : > { %v1154_v55 = vmin.f32 %v1126_v1, 6.0  ;;  %v1155_v19 = vmin.f32 %v1127_v4, 6.0  ;;  %v3054_v22 = vsel %vm628_vm0, %v853_v14, %v869_v45  ;;  %v3058_v56 = vsel %vm628_vm0, %v869_v45, %v853_v14 }
 0x102   : > { %v833_v15 = vadd.f32 %v805_v8, %v773_v33  ;;  %v834_v41 = vadd.f32 %v806_v30, %v774_v46  ;;  %v1049_v10 = vmul.f32 %v2570_v2, %v3054_v22  ;;  %v1050_v13 = vmul.f32 %v2570_v2, %v3058_v56 }
 0x103   : > { %v1179_v48 = vpack.c.bf16 %v1155_v19, %v1154_v55  ;;  %v468_v59 = vmul.f32 %v2509_v26, %v2814_v63  ;;  %v469_v9 = vmul.f32 %v2509_v26, %v2817_v0  ;;  %v500_v39 = vmul.f32 %v2512_v27, %v3003_v42 }
 0x104   : > { %v957_v17 = vadd.f32 %v2801_v53, %v833_v15  ;;  %v958_v58 = vadd.f32 %v2804_v47, %v834_v41  ;;  %v501_v8 = vmul.f32 %v2512_v27, %v3006_v18  ;;  %v560_v30 = vmul.f32 %v2515_v28, %v3061_v20 }
 0x105   : > { %1880 = vmatmul.mubr.bf16.gmra.mrb[4].mxu0 %v1179_v48  ;;  %v528_v1 = vadd.f32 %v500_v39, %v468_v59  ;;  %v561_v63 = vmul.f32 %v2515_v28, %v3068_v54  ;;  %v607_v0 = vrot.slane %v3061_v20, 1  ;;  %v623_v4 = vrot.slane %v3068_v54, 1 }
 0x106   : > { %v1017_v14 = vadd.f32 %v989_v35, %v957_v17  ;;  %v1018_v45 = vadd.f32 %v990_v21, %v958_v58  ;;  %v529_v53 = vadd.f32 %v501_v8, %v469_v9  ;;  %v687_v47 = vmul.f32 %v2549_v49, %v2848_v5 }
 0x107   : > { %v588_v33 = vadd.f32 %v560_v30, %v528_v1  ;;  %v3090_v46 = vsel %vm628_vm0, %v607_v0, %v623_v4  ;;  %v3094_v55 = vsel %vm628_vm0, %v623_v4, %v607_v0  ;;  %v688_v19 = vmul.f32 %v2549_v49, %v2852_v7 }
 0x108   : > { %v1077_v15 = vadd.f32 %v1049_v10, %v1017_v14  ;;  %v1078_v41 = vadd.f32 %v1050_v13, %v1018_v45  ;;  %v589_v35 = vadd.f32 %v561_v63, %v529_v53  ;;  %v747_v21 = vmul.f32 %v2552_v50, %v3030_v37 }
 0x109   : > { %v715_v48 = vadd.f32 %v687_v47, %v588_v33  ;;  %v748_v5 = vmul.f32 %v2552_v50, %v3034_v6  ;;  %v807_v59 = vmul.f32 %v2555_v51, %v3090_v46  ;;  %v808_v9 = vmul.f32 %v2555_v51, %v3094_v55 }
 0x10a   : > { %v1112_v39 = vadd.f32 %v2646_v11, %v1077_v15  ;;  %v1113_v7 = vadd.f32 %v2646_v11, %v1078_v41  ;;  %v716_v10 = vadd.f32 %v688_v19, %v589_v35  ;;  %v854_v13 = vrot.slane %v3090_v46, 1  ;;  %v3129_v15 = vld [vmem:[%s2456_s7 + $0x60] sm:$0xff]  ;;  %v3132_v41 = vld [vmem:[%s2456_s7 + $0x68] sm:$0xff] }
 0x10b   : > { %v775_v17 = vadd.f32 %v747_v21, %v715_v48  ;;  %v870_v58 = vrot.slane %v3094_v55, 1  ;;  %v931_v8 = vmul.f32 %v2596_v23, %v2871_v44  ;;  %v932_v30 = vmul.f32 %v2596_v23, %v2875_v57 }
 0x10c   : > { %v1140_v1 = vmax.f32 %v1112_v39, 0.0  ;;  %v1141_v63 = vmax.f32 %v1113_v7, 0.0  ;;  %v776_v0 = vadd.f32 %v748_v5, %v716_v10  ;;  %v991_v4 = vmul.f32 %v2601_v24, %v3054_v22 }
 0x10d   : > { %v835_v14 = vadd.f32 %v807_v59, %v775_v17  ;;  %v3118_v45 = vsel %vm628_vm0, %v854_v13, %v870_v58  ;;  %v3122_v53 = vsel %vm628_vm0, %v870_v58, %v854_v13  ;;  %v992_v44 = vmul.f32 %v2601_v24, %v3058_v56 }
 0x10e   : > { %v1168_v47 = vmin.f32 %v1140_v1, 6.0  ;;  %v1169_v57 = vmin.f32 %v1141_v63, 6.0  ;;  %v836_v33 = vadd.f32 %v808_v9, %v776_v0  ;;  %v1051_v19 = vmul.f32 %v2570_v2, %v3118_v45 }
 0x10f   : > { %v959_v35 = vadd.f32 %v931_v8, %v835_v14  ;;  %v1052_v21 = vmul.f32 %v2570_v2, %v3122_v53  ;;  %v454_v48 = vmul.f32 %v2509_v26, %v2865_v36  ;;  %v455_v5 = vmul.f32 %v2509_v26, %v2878_v61 }
 0x110   : > { %v1186_v59 = vpack.c.bf16 %v1169_v57, %v1168_v47  ;;  %v960_v39 = vadd.f32 %v932_v30, %v836_v33  ;;  %v486_v9 = vmul.f32 %v2512_v27, %v2937_v43  ;;  %v487_v7 = vmul.f32 %v2512_v27, %v2945_v62 }
 0x111   : > { %v1019_v10 = vadd.f32 %v991_v4, %v959_v35  ;;  %v546_v13 = vmul.f32 %v2515_v28, %v3129_v15  ;;  %v547_v17 = vmul.f32 %v2515_v28, %v3132_v41  ;;  %v600_v36 = vrot.slane %v3129_v15, 1 }
 0x112   : > { %1895 = vmatprep.mubr.bf16.mxu1 %v1186_v59  ;;  %v1020_v58 = vadd.f32 %v992_v44, %v960_v39  ;;  %v514_v61 = vadd.f32 %v486_v9, %v454_v48  ;;  %v515_v8 = vadd.f32 %v487_v7, %v455_v5  ;;  %v616_v30 = vrot.slane %v3132_v41, 1 }
 0x113   : > { %v1079_v1 = vadd.f32 %v1051_v19, %v1019_v10  ;;  %v673_v63 = vmul.f32 %v2549_v49, %v2901_v16  ;;  %v674_v0 = vmul.f32 %v2549_v49, %v2905_v40  ;;  %v733_v4 = vmul.f32 %v2552_v50, %v2967_v34 }
 0x114   : > { %v1080_v14 = vadd.f32 %v1052_v21, %v1020_v58  ;;  %v574_v47 = vadd.f32 %v546_v13, %v514_v61  ;;  %v575_v57 = vadd.f32 %v547_v17, %v515_v8  ;;  %v3158_v44 = vsel %vm628_vm0, %v600_v36, %v616_v30 }
 0x115   : > { %v1114_v33 = vadd.f32 %v2646_v11, %v1079_v1  ;;  %v3163_v19 = vsel %vm628_vm0, %v616_v30, %v600_v36  ;;  %v734_v16 = vmul.f32 %v2552_v50, %v2971_v25  ;;  %v793_v40 = vmul.f32 %v2555_v51, %v3158_v44 }
 0x116   : > { %v1115_v35 = vadd.f32 %v2646_v11, %v1080_v14  ;;  %v701_v21 = vadd.f32 %v673_v63, %v574_v47  ;;  %v702_v48 = vadd.f32 %v674_v0, %v575_v57  ;;  %v794_v5 = vmul.f32 %v2555_v51, %v3163_v19 }
 0x117   : > { %v1142_v59 = vmax.f32 %v1114_v33, 0.0  ;;  %v847_v39 = vrot.slane %v3158_v44, 1  ;;  %v863_v9 = vrot.slane %v3163_v19, 1  ;;  %v917_v7 = vmul.f32 %v2596_v23, %v2930_v52 }
 0x118   : > { %v1143_v10 = vmax.f32 %v1115_v35, 0.0  ;;  %v761_v13 = vadd.f32 %v733_v4, %v701_v21  ;;  %v762_v17 = vadd.f32 %v734_v16, %v702_v48  ;;  %v918_v36 = vmul.f32 %v2596_v23, %v2934_v60  ;;  %v3191_v4 = vld [vmem:[%s2456_s7 + $0x70] sm:$0xff]  ;;  %v3194_v60 = vld [vmem:[%s2456_s7 + $0x78] sm:$0xff] }
 0x119   : > { %v1170_v58 = vmin.f32 %v1142_v59, 6.0  ;;  %v3180_v61 = vsel %vm628_vm0, %v847_v39, %v863_v9  ;;  %v3184_v8 = vsel %vm628_vm0, %v863_v9, %v847_v39  ;;  %v977_v30 = vmul.f32 %v2601_v24, %v2990_v31 }
 0x11a   : > { %v1171_v1 = vmin.f32 %v1143_v10, 6.0  ;;  %v821_v52 = vadd.f32 %v793_v40, %v761_v13  ;;  %v822_v63 = vadd.f32 %v794_v5, %v762_v17  ;;  %v978_v0 = vmul.f32 %v2601_v24, %v2994_v32 }
 0x11b   : > { %v1037_v14 = vmul.f32 %v2570_v2, %v3180_v61  ;;  %v1038_v47 = vmul.f32 %v2570_v2, %v3184_v8  ;;  %v456_v57 = vmul.f32 %v2509_v26, %v2937_v43  ;;  %v457_v33 = vmul.f32 %v2509_v26, %v2945_v62 }
 0x11c   : > { %v1187_v16 = vpack.c.bf16 %v1171_v1, %v1170_v58  ;;  %v945_v40 = vadd.f32 %v917_v7, %v821_v52  ;;  %v946_v35 = vadd.f32 %v918_v36, %v822_v63  ;;  %v488_v21 = vmul.f32 %v2512_v27, %v3129_v15 }
 0x11d   : > { %v489_v48 = vmul.f32 %v2512_v27, %v3132_v41  ;;  %v548_v5 = vmul.f32 %v2515_v28, %v3191_v4  ;;  %v549_v2 = vmul.f32 %v2515_v28, %v3194_v60  ;;  %v601_v43 = vrot.slane %v3191_v4, 1 }
 0x11e   : > { %1896 = vmatmul.mubr.bf16.gmra.mrb[4].mxu1 %v1187_v16  ;;  %v1005_v59 = vadd.f32 %v977_v30, %v945_v40  ;;  %v1006_v62 = vadd.f32 %v978_v0, %v946_v35  ;;  %v516_v39 = vadd.f32 %v488_v21, %v456_v57  ;;  %v617_v9 = vrot.slane %v3194_v60, 1 }
 0x11f   : > { %v517_v7 = vadd.f32 %v489_v48, %v457_v33  ;;  %v675_v10 = vmul.f32 %v2549_v49, %v2967_v34  ;;  %v676_v13 = vmul.f32 %v2549_v49, %v2971_v25  ;;  %v735_v17 = vmul.f32 %v2552_v50, %v3158_v44 }
 0x120   : > { %v1065_v36 = vadd.f32 %v1037_v14, %v1005_v59  ;;  %v1066_v58 = vadd.f32 %v1038_v47, %v1006_v62  ;;  %v576_v1 = vadd.f32 %v548_v5, %v516_v39  ;;  %v3222_v30 = vsel %vm628_vm0, %v601_v43, %v617_v9 }
 0x121   : > { %v577_v52 = vadd.f32 %v549_v2, %v517_v7  ;;  %v3226_v63 = vsel %vm628_vm0, %v617_v9, %v601_v43  ;;  %v736_v34 = vmul.f32 %v2552_v50, %v3163_v19  ;;  %v795_v25 = vmul.f32 %v2555_v51, %v3222_v30 }
 0x122   : > { %v1100_v0 = vadd.f32 %v2646_v11, %v1065_v36  ;;  %v1101_v14 = vadd.f32 %v2646_v11, %v1066_v58  ;;  %v703_v47 = vadd.f32 %v675_v10, %v576_v1  ;;  %v796_v57 = vmul.f32 %v2555_v51, %v3226_v63  ;;  %v3258_v36 = vld [vmem:[#allocation6 + $0x8] ss:$0 sm:$0xff] }
 0x123   : > { %v704_v33 = vadd.f32 %v676_v13, %v577_v52  ;;  %v848_v16 = vrot.slane %v3222_v30, 1  ;;  %v864_v40 = vrot.slane %v3226_v63, 1  ;;  %v919_v35 = vmul.f32 %v2596_v23, %v2990_v31  ;;  %v436_v13 = vld [vmem:[%s2464_s30] sm:$0xff] }
 0x124   : > { %v1128_v21 = vmax.f32 %v1100_v0, 0.0  ;;  %v1129_v48 = vmax.f32 %v1101_v14, 0.0  ;;  %v763_v5 = vadd.f32 %v735_v17, %v703_v47  ;;  %v920_v2 = vmul.f32 %v2596_v23, %v2994_v32  ;;  %v3256_v32 = vld [vmem:[%s2464_s30 + $0x8] sm:$0xff] }
 0x125   : > { %v764_v43 = vadd.f32 %v736_v34, %v704_v33  ;;  %v3244_v59 = vsel %vm628_vm0, %v848_v16, %v864_v40  ;;  %v3248_v62 = vsel %vm628_vm0, %v864_v40, %v848_v16  ;;  %v979_v39 = vmul.f32 %v2601_v24, %v3180_v61 }
 0x126   : > { %v1156_v9 = vmin.f32 %v1128_v21, 6.0  ;;  %v1157_v31 = vmin.f32 %v1129_v48, 6.0  ;;  %v823_v7 = vadd.f32 %v795_v25, %v763_v5  ;;  %v980_v10 = vmul.f32 %v2601_v24, %v3184_v8 }
 0x127   : > { %v824_v17 = vadd.f32 %v796_v57, %v764_v43  ;;  %v1039_v58 = vmul.f32 %v3258_v36, %v3244_v59  ;;  %v1040_v1 = vmul.f32 %v3258_v36, %v3248_v62  ;;  %v470_v52 = vmul.f32 %v2509_v26, %v3003_v42 }
 0x128   : > { %v1180_v34 = vpack.c.bf16 %v1157_v31, %v1156_v9  ;;  %v947_v25 = vadd.f32 %v919_v35, %v823_v7  ;;  %v471_v0 = vmul.f32 %v2509_v26, %v3006_v18  ;;  %v502_v14 = vmul.f32 %v2512_v27, %v3061_v20 }
 0x129   : > { %v948_v47 = vadd.f32 %v920_v2, %v824_v17  ;;  %v503_v57 = vmul.f32 %v2512_v27, %v3068_v54  ;;  %v562_v33 = vmul.f32 %v2515_v28, %v436_v13  ;;  %v563_v16 = vmul.f32 %v2515_v28, %v3256_v32 }
 0x12a   : > { %1883 = vmatprep.mubr.bf16.mxu0 %v1180_v34  ;;  %v1007_v40 = vadd.f32 %v979_v39, %v947_v25  ;;  %v530_v42 = vadd.f32 %v502_v14, %v470_v52  ;;  %v608_v21 = vrot.slane %v436_v13, 1  ;;  %v624_v35 = vrot.slane %v3256_v32, 1 }
 0x12b   : > { %v1008_v48 = vadd.f32 %v980_v10, %v948_v47  ;;  %v531_v18 = vadd.f32 %v503_v57, %v471_v0  ;;  %v689_v5 = vmul.f32 %v2549_v49, %v3030_v37  ;;  %v690_v2 = vmul.f32 %v2549_v49, %v3034_v6 }
 0x12c   : > { %v1067_v43 = vadd.f32 %v1039_v58, %v1007_v40  ;;  %v590_v9 = vadd.f32 %v562_v33, %v530_v42  ;;  %v643_v31 = vsel %vm628_vm0, %v608_v21, %v624_v35  ;;  %v659_v39 = vsel %vm628_vm0, %v624_v35, %v608_v21 }
 0x12d   : > { %v1068_v7 = vadd.f32 %v1040_v1, %v1008_v48  ;;  %v591_v17 = vadd.f32 %v563_v16, %v531_v18  ;;  %v749_v10 = vmul.f32 %v2552_v50, %v3090_v46  ;;  %v750_v52 = vmul.f32 %v2552_v50, %v3094_v55 }
 0x12e   : > { %v1102_v37 = vadd.f32 %v2646_v11, %v1067_v43  ;;  %v717_v34 = vadd.f32 %v689_v5, %v590_v9  ;;  %v809_v6 = vmul.f32 %v2555_v51, %v643_v31  ;;  %v810_v58 = vmul.f32 %v2555_v51, %v659_v39 }
 0x12f   : > { %v1103_v25 = vadd.f32 %v2646_v11, %v1068_v7  ;;  %v718_v0 = vadd.f32 %v690_v2, %v591_v17  ;;  %v855_v14 = vrot.slane %v643_v31, 1  ;;  %v871_v1 = vrot.slane %v659_v39, 1  ;;  %v439_v7 = vld [vmem:[%s2464_s30 + $0x18] sm:$0xff] }
 0x130   : > { %v1130_v47 = vmax.f32 %v1102_v37, 0.0  ;;  %v777_v57 = vadd.f32 %v749_v10, %v717_v34  ;;  %v933_v33 = vmul.f32 %v2596_v23, %v3054_v22  ;;  %v934_v16 = vmul.f32 %v2596_v23, %v3058_v56  ;;  %v438_v22 = vld [vmem:[%s2464_s30 + $0x10] sm:$0xff] }
 0x131   : > { %v1131_v40 = vmax.f32 %v1103_v25, 0.0  ;;  %v778_v42 = vadd.f32 %v750_v52, %v718_v0  ;;  %v887_v21 = vsel %vm628_vm0, %v855_v14, %v871_v1  ;;  %v903_v11 = vsel %vm628_vm0, %v871_v1, %v855_v14 }
 0x132   : > { %v1158_v35 = vmin.f32 %v1130_v47, 6.0  ;;  %v837_v48 = vadd.f32 %v809_v6, %v777_v57  ;;  %v993_v18 = vmul.f32 %v2601_v24, %v3118_v45  ;;  %v994_v5 = vmul.f32 %v2601_v24, %v3122_v53 }
 0x133   : > { %v1159_v2 = vmin.f32 %v1131_v40, 6.0  ;;  %v838_v43 = vadd.f32 %v810_v58, %v778_v42  ;;  %v1053_v56 = vmul.f32 %v3258_v36, %v887_v21  ;;  %v1054_v9 = vmul.f32 %v3258_v36, %v903_v11 }
 0x134   : > { %v961_v17 = vadd.f32 %v933_v33, %v837_v48  ;;  %v472_v10 = vmul.f32 %v2509_v26, %v3061_v20  ;;  %v473_v52 = vmul.f32 %v2509_v26, %v3068_v54  ;;  %v504_v37 = vmul.f32 %v2512_v27, %v436_v13 }
 0x135   : > { %v1181_v34 = vpack.c.bf16 %v1159_v2, %v1158_v35  ;;  %v962_v6 = vadd.f32 %v934_v16, %v838_v43  ;;  %v505_v25 = vmul.f32 %v2512_v27, %v3256_v32  ;;  %v564_v58 = vmul.f32 %v2515_v28, %v438_v22 }
 0x136   : > { %v1021_v0 = vadd.f32 %v993_v18, %v961_v17  ;;  %v532_v14 = vadd.f32 %v504_v37, %v472_v10  ;;  %v565_v1 = vmul.f32 %v2515_v28, %v439_v7  ;;  %v609_v47 = vrot.slane %v438_v22, 1 }
 0x137   : > { %1884 = vmatmul.mubr.bf16.gmra.mrb[8].mxu0 %v1181_v34  ;;  %v1022_v57 = vadd.f32 %v994_v5, %v962_v6  ;;  %v533_v20 = vadd.f32 %v505_v25, %v473_v52  ;;  %v625_v33 = vrot.slane %v439_v7, 1  ;;  %v691_v54 = vmul.f32 %v2549_v49, %v3090_v46  ;;  %v3329_v5 = vld [vmem:[%s3513_s3] ss:$0 sm:$0xff] }
 0x138   : > { %v1081_v13 = vadd.f32 %v1053_v56, %v1021_v0  ;;  %v592_v40 = vadd.f32 %v564_v58, %v532_v14  ;;  %v692_v16 = vmul.f32 %v2549_v49, %v3094_v55  ;;  %v751_v32 = vmul.f32 %v2552_v50, %v643_v31 }
 0x139   : > { %v1082_v42 = vadd.f32 %v1054_v9, %v1022_v57  ;;  %v593_v35 = vadd.f32 %v565_v1, %v533_v20  ;;  %v644_v48 = vsel %vm628_vm0, %v609_v47, %v625_v33  ;;  %v660_v18 = vsel %vm628_vm0, %v625_v33, %v609_v47 }
 0x13a   : > { %v1116_v46 = vadd.f32 %v3329_v5, %v1081_v13  ;;  %v719_v22 = vadd.f32 %v691_v54, %v592_v40  ;;  %v752_v55 = vmul.f32 %v2552_v50, %v659_v39  ;;  %v811_v31 = vmul.f32 %v2555_v51, %v644_v48 }
 0x13b   : > { %v1117_v2 = vadd.f32 %v3329_v5, %v1082_v42  ;;  %v720_v43 = vadd.f32 %v692_v16, %v593_v35  ;;  %v812_v56 = vmul.f32 %v2555_v51, %v660_v18  ;;  %v856_v9 = vrot.slane %v644_v48, 1  ;;  %v2017_v16 = vld [vmem:[%s2456_s7 + $0x80] sm:$0xff]  ;;  %v2018_v42 = vld [vmem:[%s2456_s7 + $0x88] sm:$0xff] }
 0x13c   : > { %v1144_v7 = vmax.f32 %v1116_v46, 0.0  ;;  %v779_v17 = vadd.f32 %v751_v32, %v719_v22  ;;  %v872_v10 = vrot.slane %v660_v18, 1  ;;  %v935_v52 = vmul.f32 %v2596_v23, %v3118_v45 }
 0x13d   : > { %v1145_v37 = vmax.f32 %v1117_v2, 0.0  ;;  %v780_v34 = vadd.f32 %v752_v55, %v720_v43  ;;  %v936_v6 = vmul.f32 %v2596_v23, %v3122_v53  ;;  %v995_v39 = vmul.f32 %v2601_v24, %v887_v21 }
 0x13e   : > { %v1172_v25 = vmin.f32 %v1144_v7, 6.0  ;;  %v839_v58 = vadd.f32 %v811_v31, %v779_v17  ;;  %v888_v0 = vsel %vm628_vm0, %v856_v9, %v872_v10  ;;  %v904_v14 = vsel %vm628_vm0, %v872_v10, %v856_v9 }
 0x13f   : > { %v1173_v1 = vmin.f32 %v1145_v37, 6.0  ;;  %v840_v47 = vadd.f32 %v812_v56, %v780_v34  ;;  %v996_v45 = vmul.f32 %v2601_v24, %v903_v11  ;;  %v1055_v57 = vmul.f32 %v3258_v36, %v888_v0 }
 0x140   : > { %v963_v20 = vadd.f32 %v935_v52, %v839_v58  ;;  %v1056_v53 = vmul.f32 %v3258_v36, %v904_v14  ;;  %v458_v21 = vmul.f32 %v2509_v26, %v3129_v15  ;;  %v459_v33 = vmul.f32 %v2509_v26, %v3132_v41 }
 0x141   : > { %v1188_v54 = vpack.c.bf16 %v1173_v1, %v1172_v25  ;;  %v964_v13 = vadd.f32 %v936_v6, %v840_v47  ;;  %v490_v3 = vmul.f32 %v2512_v27, %v3191_v4  ;;  %v491_v40 = vmul.f32 %v2512_v27, %v3194_v60 }
 0x142   : > { %v1023_v11 = vadd.f32 %v995_v39, %v963_v20  ;;  %v550_v32 = vmul.f32 %v2017_v16, %v2515_v28  ;;  %v551_v35 = vmul.f32 %v2018_v42, %v2515_v28  ;;  %v677_v15 = vmul.f32 %v2549_v49, %v3158_v44 }
 0x143   : > { %1899 = vmatprep.mubr.bf16.mxu1 %v1188_v54  ;;  %v1024_v41 = vadd.f32 %v996_v45, %v964_v13  ;;  %v518_v48 = vadd.f32 %v490_v3, %v458_v21  ;;  %v519_v18 = vadd.f32 %v491_v40, %v459_v33  ;;  %v678_v46 = vmul.f32 %v2549_v49, %v3163_v19  ;;  %v2020_v54 = vld [vmem:[%s2456_s7 + $0x98] sm:$0xff] }
 0x144   : > { %v1083_v22 = vadd.f32 %v1055_v57, %v1023_v11  ;;  %v737_v55 = vmul.f32 %v2552_v50, %v3222_v30  ;;  %v738_v31 = vmul.f32 %v2552_v50, %v3226_v63  ;;  %v797_v44 = vmul.f32 %v2555_v51, %v2719_v38  ;;  %v2019_v57 = vld [vmem:[%s2456_s7 + $0x90] sm:$0xff] }
 0x145   : > { %v1084_v2 = vadd.f32 %v1056_v53, %v1024_v41  ;;  %v578_v43 = vadd.f32 %v550_v32, %v518_v48  ;;  %v579_v56 = vadd.f32 %v551_v35, %v519_v18  ;;  %v798_v7 = vmul.f32 %v2555_v51, %v2731_v29 }
 0x146   : > { %v1118_v9 = vadd.f32 %v3329_v5, %v1083_v22  ;;  %v921_v19 = vmul.f32 %v2596_v23, %v3180_v61  ;;  %v922_v17 = vmul.f32 %v2596_v23, %v3184_v8  ;;  %v981_v34 = vmul.f32 %v2601_v24, %v3244_v59 }
 0x147   : > { %v1119_v10 = vadd.f32 %v3329_v5, %v1084_v2  ;;  %v705_v52 = vadd.f32 %v677_v15, %v578_v43  ;;  %v706_v37 = vadd.f32 %v678_v46, %v579_v56  ;;  %v982_v39 = vmul.f32 %v2601_v24, %v3248_v62  ;;  %v3556_v46 = vld [vmem:[#allocation14_spill] sm:$0xff] }
 0x148   : > { %v1146_v6 = vmax.f32 %v1118_v9, 0.0  ;;  %v1041_v25 = vmul.f32 %v3258_v36, %v2770_v12  ;;  %v460_v61 = vmul.f32 %v2509_v26, %v3191_v4  ;;  %v461_v14 = vmul.f32 %v2509_v26, %v3194_v60 }
 0x149   : > { %v1147_v8 = vmax.f32 %v1119_v10, 0.0  ;;  %v765_v58 = vadd.f32 %v737_v55, %v705_v52  ;;  %v766_v0 = vadd.f32 %v738_v31, %v706_v37  ;;  %v492_v47 = vmul.f32 %v2017_v16, %v2512_v27  ;;  %v3554_v16 = vld [vmem:[#allocation15_spill] sm:$0xff] }
 0x14a   : > { %v1174_v1 = vmin.f32 %v1146_v6, 6.0  ;;  %v493_v45 = vmul.f32 %v2018_v42, %v2512_v27  ;;  %v552_v20 = vmul.f32 %v2019_v57, %v2515_v28  ;;  %v553_v4 = vmul.f32 %v2020_v54, %v2515_v28 }
 0x14b   : > { %v1175_v53 = vmin.f32 %v1147_v8, 6.0  ;;  %v825_v21 = vadd.f32 %v797_v44, %v765_v58  ;;  %v826_v33 = vadd.f32 %v798_v7, %v766_v0  ;;  %v520_v13 = vadd.f32 %v492_v47, %v460_v61 }
 0x14c   : > { %v521_v3 = vadd.f32 %v493_v45, %v461_v14  ;;  %v679_v40 = vmul.f32 %v2549_v49, %v3222_v30  ;;  %v680_v26 = vmul.f32 %v2549_v49, %v3226_v63  ;;  %v1042_v32 = vmul.f32 %v3258_v36, %v3554_v16  ;;  %v3555_v49 = vld [vmem:[#allocation13_spill] sm:$0xff] }
 0x14d   : > { %v1189_v60 = vpack.c.bf16 %v1175_v53, %v1174_v1  ;;  %v949_v11 = vadd.f32 %v921_v19, %v825_v21  ;;  %v950_v27 = vadd.f32 %v922_v17, %v826_v33  ;;  %v580_v42 = vadd.f32 %v552_v20, %v520_v13 }
 0x14e   : > { %v581_v35 = vadd.f32 %v553_v4, %v521_v3  ;;  %v739_v15 = vmul.f32 %v2552_v50, %v2719_v38  ;;  %v740_v28 = vmul.f32 %v2552_v50, %v2731_v29  ;;  %v799_v63 = vmul.f32 %v2555_v51, %v3555_v49 }
 0x14f   : > { %1900 = vmatmul.mubr.bf16.gmra.mrb[8].mxu1 %v1189_v60  ;;  %v1009_v41 = vadd.f32 %v981_v34, %v949_v11  ;;  %v1010_v30 = vadd.f32 %v982_v39, %v950_v27  ;;  %v707_v48 = vadd.f32 %v679_v40, %v580_v42  ;;  %v800_v22 = vmul.f32 %v2555_v51, %v3556_v46 }
 0x150   : > { %v708_v18 = vadd.f32 %v680_v26, %v581_v35  ;;  %v923_v38 = vmul.f32 %v2596_v23, %v3244_v59  ;;  %v924_v50 = vmul.f32 %v2596_v23, %v3248_v62  ;;  %v983_v7 = vmul.f32 %v2601_v24, %v2770_v12  ;;  %v3557_v59 = vld [vmem:[#allocation16_spill] sm:$0xff]  ;;  %v3558_v23 = vld [vmem:[#allocation17_spill] sm:$0xff] }
 0x151   : > { %v1069_v55 = vadd.f32 %v1041_v25, %v1009_v41  ;;  %v1070_v31 = vadd.f32 %v1042_v32, %v1010_v30  ;;  %v767_v2 = vadd.f32 %v739_v15, %v707_v48  ;;  %v984_v51 = vmul.f32 %v2601_v24, %v3554_v16 }
 0x152   : > { %v768_v43 = vadd.f32 %v740_v28, %v708_v18  ;;  %v1043_v37 = vmul.f32 %v3258_v36, %v3557_v59  ;;  %v1044_v62 = vmul.f32 %v3258_v36, %v3558_v23  ;;  %v3429_v36 = vld [vmem:[%s3515_s5] ss:$0 sm:$0xff] }
 0x153   : > { %v1104_v29 = vadd.f32 %v3329_v5, %v1069_v55  ;;  %v1105_v56 = vadd.f32 %v3329_v5, %v1070_v31  ;;  %v827_v44 = vadd.f32 %v799_v63, %v767_v2 }
 0x154   : > { %v828_v9 = vadd.f32 %v800_v22, %v768_v43 }
 0x155   : > { %v1132_v19 = vmax.f32 %v1104_v29, 0.0  ;;  %v1133_v17 = vmax.f32 %v1105_v56, 0.0  ;;  %v951_v10 = vadd.f32 %v923_v38, %v827_v44 }
 0x156   : > { %v952_v52 = vadd.f32 %v924_v50, %v828_v9 }
 0x157   : > { %v1160_v34 = vmin.f32 %v1132_v19, 6.0  ;;  %v1161_v6 = vmin.f32 %v1133_v17, 6.0  ;;  %v1011_v39 = vadd.f32 %v983_v7, %v951_v10 }
 0x158   : > { %v1012_v25 = vadd.f32 %v984_v51, %v952_v52 }
 0x159   : > { %v1182_v12 = vpack.c.bf16 %v1161_v6, %v1160_v34  ;;  %v1071_v61 = vadd.f32 %v1043_v37, %v1011_v39 }
 0x15a   : > { %v1072_v8 = vadd.f32 %v1044_v62, %v1012_v25 }
 0x15b   : > { %1887 = vmatprep.mubr.bf16.mxu0 %v1182_v12  ;;  %v1106_v24 = vadd.f32 %v3329_v5, %v1071_v61 }
 0x15c   : > { %v1107_v58 = vadd.f32 %v3329_v5, %v1072_v8 }
 0x15d   : > { %v1134_v0 = vmax.f32 %v1106_v24, 0.0 }
 0x15e   : > { %v1135_v14 = vmax.f32 %v1107_v58, 0.0 }
 0x15f   : > { %v1162_v1 = vmin.f32 %v1134_v0, 6.0 }
 0x160   : > { %v1163_v47 = vmin.f32 %v1135_v14, 6.0 }
 0x162   : > { %v1183_v45 = vpack.c.bf16 %v1163_v47, %v1162_v1 }
 0x164   : > { %1888 = vmatmul.mubr.bf16.gmra.mrb[12].mxu0 %v1183_v45 }
 0x1a7   : > { %v1877_v57 = vpop.f32.mrb[0].mxu0 }
 0x1a8   : > { %v1304_v20 = vadd.f32 %v1877_v57, %v3429_v36  ;;  %v1295_v53 = vpop.f32.mrb[1].mxu0 }
 0x1a9   : > { %v1296_v5 = vadd.f32 %v3429_v36, %v1295_v53  ;;  %v1878_v21 = vpop.f32.mrb[2].mxu0 }
 0x1aa   : > { %v1408_v33 = vmax.f32 %v1304_v20, 0.0  ;;  %v1307_v54 = vadd.f32 %v1878_v21, %v3429_v36  ;;  %v1298_v4 = vpop.f32.mrb[3].mxu0 }
 0x1ab   : > { %v1406_v13 = vmax.f32 %v1296_v5, 0.0  ;;  %v1299_v3 = vadd.f32 %v3429_v36, %v1298_v4 }
 0x1ac   : > { %v1436_v40 = vmin.f32 %v1408_v33, 6.0  ;;  %v1409_v26 = vmax.f32 %v1307_v54, 0.0 }
 0x1ad   : > { %v1434_v60 = vmin.f32 %v1406_v13, 6.0  ;;  %v1407_v11 = vmax.f32 %v1299_v3, 0.0 }
 0x1ae   : > { %v1810_v27 = vpack.c.bf16 %v1436_v40, %v1436_v40  ;;  %v1437_v16 = vmin.f32 %v1409_v26, 6.0 }
 0x1af   : > { %v1808_v32 = vpack.c.bf16 %v1434_v60, %v1434_v60  ;;  %v1435_v42 = vmin.f32 %v1407_v11, 6.0 }
 0x1b0   : > { %1576 = vst [vmem:[%s3438_s17 + $0x8] sm:$0xf] %v1810_v27  ;;  %v1811_v35 = vpack.c.bf16 %v1437_v16, %v1437_v16 }
 0x1b1   : > { %1574 = vst [vmem:[%s3438_s17] sm:$0xf] %v1808_v32  ;;  %v1809_v15 = vpack.c.bf16 %v1435_v42, %v1435_v42 }
 0x1b2   : > { %1577 = vst [vmem:[%s3438_s17 + $0xc] sm:$0x7] %v1811_v35 }
 0x1b3   : > { %1575 = vst [vmem:[%s3438_s17 + $0x4] sm:$0x7] %v1809_v15 }
 0x1c3   : > { %v1893_v28 = vpop.f32.mrb[0].mxu1 }
 0x1c4   : > { %v1368_v41 = vadd.f32 %v1893_v28, %v3429_v36  ;;  %v1359_v30 = vpop.f32.mrb[1].mxu1 }
 0x1c5   : > { %v1360_v48 = vadd.f32 %v3429_v36, %v1359_v30  ;;  %v1894_v18 = vpop.f32.mrb[2].mxu1 }
 0x1c6   : > { %v1424_v49 = vmax.f32 %v1368_v41, 0.0  ;;  %v1371_v63 = vadd.f32 %v1894_v18, %v3429_v36  ;;  %v1362_v46 = vpop.f32.mrb[3].mxu1 }
 0x1c7   : > { %v1422_v22 = vmax.f32 %v1360_v48, 0.0  ;;  %v1363_v55 = vadd.f32 %v3429_v36, %v1362_v46 }
 0x1c8   : > { %v1452_v31 = vmin.f32 %v1424_v49, 6.0  ;;  %v1425_v2 = vmax.f32 %v1371_v63, 0.0 }
 0x1c9   : > { %v1450_v43 = vmin.f32 %v1422_v22, 6.0  ;;  %v1423_v38 = vmax.f32 %v1363_v55, 0.0 }
 0x1ca   : > { %v1826_v50 = vpack.c.bf16 %v1452_v31, %v1452_v31  ;;  %v1453_v29 = vmin.f32 %v1425_v2, 6.0 }
 0x1cb   : > { %v1824_v56 = vpack.c.bf16 %v1450_v43, %v1450_v43  ;;  %v1451_v44 = vmin.f32 %v1423_v38, 6.0 }
 0x1cc   : > { %1592 = vst [vmem:[%s3438_s17 + $0x48] sm:$0xf] %v1826_v50  ;;  %v1827_v9 = vpack.c.bf16 %v1453_v29, %v1453_v29 }
 0x1cd   : > { %1590 = vst [vmem:[%s3438_s17 + $0x40] sm:$0xf] %v1824_v56  ;;  %v1825_v7 = vpack.c.bf16 %v1451_v44, %v1451_v44 }
 0x1ce   : > { %1593 = vst [vmem:[%s3438_s17 + $0x4c] sm:$0x7] %v1827_v9 }
 0x1cf   : > { %1591 = vst [vmem:[%s3438_s17 + $0x44] sm:$0x7] %v1825_v7 }
 0x1d8   : > { %v1881_v51 = vpop.f32.mrb[4].mxu0 }
 0x1d9   : > { %v1320_v19 = vadd.f32 %v1881_v51, %v3429_v36  ;;  %v1311_v17 = vpop.f32.mrb[5].mxu0 }
 0x1da   : > { %v1312_v10 = vadd.f32 %v3429_v36, %v1311_v17  ;;  %v1882_v52 = vpop.f32.mrb[6].mxu0 }
 0x1db   : > { %v1412_v59 = vmax.f32 %v1320_v19, 0.0  ;;  %v1323_v37 = vadd.f32 %v1882_v52, %v3429_v36  ;;  %v1314_v23 = vpop.f32.mrb[7].mxu0 }
 0x1dc   : > { %v1410_v62 = vmax.f32 %v1312_v10, 0.0  ;;  %v1315_v34 = vadd.f32 %v3429_v36, %v1314_v23 }
 0x1dd   : > { %v1440_v6 = vmin.f32 %v1412_v59, 6.0  ;;  %v1413_v39 = vmax.f32 %v1323_v37, 0.0 }
 0x1de   : > { %v1438_v25 = vmin.f32 %v1410_v62, 6.0  ;;  %v1411_v12 = vmax.f32 %v1315_v34, 0.0 }
 0x1df   : > { %v1814_v61 = vpack.c.bf16 %v1440_v6, %v1440_v6  ;;  %v1441_v8 = vmin.f32 %v1413_v39, 6.0 }
 0x1e0   : > { %v1812_v24 = vpack.c.bf16 %v1438_v25, %v1438_v25  ;;  %v1439_v58 = vmin.f32 %v1411_v12, 6.0 }
 0x1e1   : > { %1580 = vst [vmem:[%s3438_s17 + $0x18] sm:$0xf] %v1814_v61  ;;  %v1815_v0 = vpack.c.bf16 %v1441_v8, %v1441_v8 }
 0x1e2   : > { %1578 = vst [vmem:[%s3438_s17 + $0x10] sm:$0xf] %v1812_v24  ;;  %v1813_v14 = vpack.c.bf16 %v1439_v58, %v1439_v58 }
 0x1e3   : > { %1581 = vst [vmem:[%s3438_s17 + $0x1c] sm:$0x7] %v1815_v0 }
 0x1e4   : > { %1579 = vst [vmem:[%s3438_s17 + $0x14] sm:$0x7] %v1813_v14 }
 0x1f1   : > { %v1897_v1 = vpop.f32.mrb[4].mxu1 }
 0x1f2   : > { %v1384_v47 = vadd.f32 %v1897_v1, %v3429_v36  ;;  %v1375_v45 = vpop.f32.mrb[5].mxu1 }
 0x1f3   : > { %v1376_v57 = vadd.f32 %v3429_v36, %v1375_v45  ;;  %v1898_v20 = vpop.f32.mrb[6].mxu1 }
 0x1f4   : > { %v1428_v53 = vmax.f32 %v1384_v47, 0.0  ;;  %v1387_v5 = vadd.f32 %v1898_v20, %v3429_v36  ;;  %v1378_v21 = vpop.f32.mrb[7].mxu1 }
 0x1f5   : > { %v1426_v33 = vmax.f32 %v1376_v57, 0.0  ;;  %v1379_v54 = vadd.f32 %v3429_v36, %v1378_v21 }
 0x1f6   : > { %v1456_v4 = vmin.f32 %v1428_v53, 6.0  ;;  %v1429_v13 = vmax.f32 %v1387_v5, 0.0 }
 0x1f7   : > { %v1454_v3 = vmin.f32 %v1426_v33, 6.0  ;;  %v1427_v40 = vmax.f32 %v1379_v54, 0.0 }
 0x1f8   : > { %v1830_v26 = vpack.c.bf16 %v1456_v4, %v1456_v4  ;;  %v1457_v60 = vmin.f32 %v1429_v13, 6.0 }
 0x1f9   : > { %v1828_v11 = vpack.c.bf16 %v1454_v3, %v1454_v3  ;;  %v1455_v27 = vmin.f32 %v1427_v40, 6.0 }
 0x1fa   : > { %1596 = vst [vmem:[%s3438_s17 + $0x58] sm:$0xf] %v1830_v26  ;;  %v1831_v16 = vpack.c.bf16 %v1457_v60, %v1457_v60 }
 0x1fb   : > { %1594 = vst [vmem:[%s3438_s17 + $0x50] sm:$0xf] %v1828_v11  ;;  %v1829_v32 = vpack.c.bf16 %v1455_v27, %v1455_v27 }
 0x1fc   : > { %1597 = vst [vmem:[%s3438_s17 + $0x5c] sm:$0x7] %v1831_v16 }
 0x1fd   : > { %1595 = vst [vmem:[%s3438_s17 + $0x54] sm:$0x7] %v1829_v32 }
 0x20a   : > { %v1885_v42 = vpop.f32.mrb[8].mxu0 }
 0x20b   : > { %v1336_v35 = vadd.f32 %v1885_v42, %v3429_v36  ;;  %v1327_v15 = vpop.f32.mrb[9].mxu0 }
 0x20c   : > { %v1328_v28 = vadd.f32 %v3429_v36, %v1327_v15  ;;  %v1886_v41 = vpop.f32.mrb[10].mxu0 }
 0x20d   : > { %v1416_v30 = vmax.f32 %v1336_v35, 0.0  ;;  %v1339_v48 = vadd.f32 %v1886_v41, %v3429_v36  ;;  %v1330_v18 = vpop.f32.mrb[11].mxu0 }
 0x20e   : > { %v1414_v49 = vmax.f32 %v1328_v28, 0.0  ;;  %v1331_v63 = vadd.f32 %v3429_v36, %v1330_v18 }
 0x20f   : > { %v1444_v46 = vmin.f32 %v1416_v30, 6.0  ;;  %v1417_v22 = vmax.f32 %v1339_v48, 0.0 }
 0x210   : > { %v1442_v55 = vmin.f32 %v1414_v49, 6.0  ;;  %v1415_v31 = vmax.f32 %v1331_v63, 0.0 }
 0x211   : > { %v1818_v2 = vpack.c.bf16 %v1444_v46, %v1444_v46  ;;  %v1445_v43 = vmin.f32 %v1417_v22, 6.0 }
 0x212   : > { %v1816_v38 = vpack.c.bf16 %v1442_v55, %v1442_v55  ;;  %v1443_v50 = vmin.f32 %v1415_v31, 6.0 }
 0x213   : > { %1584 = vst [vmem:[%s3438_s17 + $0x28] sm:$0xf] %v1818_v2  ;;  %v1819_v29 = vpack.c.bf16 %v1445_v43, %v1445_v43 }
 0x214   : > { %1582 = vst [vmem:[%s3438_s17 + $0x20] sm:$0xf] %v1816_v38  ;;  %v1817_v56 = vpack.c.bf16 %v1443_v50, %v1443_v50 }
 0x215   : > { %1585 = vst [vmem:[%s3438_s17 + $0x2c] sm:$0x7] %v1819_v29 }
 0x216   : > { %1583 = vst [vmem:[%s3438_s17 + $0x24] sm:$0x7] %v1817_v56 }
 0x222   : > { %v1901_v44 = vpop.f32.mrb[8].mxu1 }
 0x223   : > { %v1400_v9 = vadd.f32 %v1901_v44, %v3429_v36  ;;  %v1391_v7 = vpop.f32.mrb[9].mxu1 }
 0x224   : > { %v1392_v51 = vadd.f32 %v3429_v36, %v1391_v7  ;;  %v1902_v19 = vpop.f32.mrb[10].mxu1 }
 0x225   : > { %v1432_v17 = vmax.f32 %v1400_v9, 0.0  ;;  %v1403_v10 = vadd.f32 %v1902_v19, %v3429_v36  ;;  %v1394_v52 = vpop.f32.mrb[11].mxu1 }
 0x226   : > { %v1430_v59 = vmax.f32 %v1392_v51, 0.0  ;;  %v1395_v37 = vadd.f32 %v3429_v36, %v1394_v52 }
 0x227   : > { %v1460_v23 = vmin.f32 %v1432_v17, 6.0  ;;  %v1433_v62 = vmax.f32 %v1403_v10, 0.0 }
 0x228   : > { %v1458_v34 = vmin.f32 %v1430_v59, 6.0  ;;  %v1431_v6 = vmax.f32 %v1395_v37, 0.0 }
 0x229   : > { %v1834_v39 = vpack.c.bf16 %v1460_v23, %v1460_v23  ;;  %v1461_v25 = vmin.f32 %v1433_v62, 6.0 }
 0x22a   : > { %v1832_v12 = vpack.c.bf16 %v1458_v34, %v1458_v34  ;;  %v1459_v61 = vmin.f32 %v1431_v6, 6.0 }
 0x22b   : > { %1600 = vst [vmem:[%s3438_s17 + $0x68] sm:$0xf] %v1834_v39  ;;  %v1835_v8 = vpack.c.bf16 %v1461_v25, %v1461_v25 }
 0x22c   : > { %1598 = vst [vmem:[%s3438_s17 + $0x60] sm:$0xf] %v1832_v12  ;;  %v1833_v24 = vpack.c.bf16 %v1459_v61, %v1459_v61 }
 0x22d   : > { %1601 = vst [vmem:[%s3438_s17 + $0x6c] sm:$0x7] %v1835_v8 }
 0x22e   : > { %1599 = vst [vmem:[%s3438_s17 + $0x64] sm:$0x7] %v1833_v24 }
 0x237   : > { %v1889_v58 = vpop.f32.mrb[12].mxu0 }
 0x238   : > { %v1352_v0 = vadd.f32 %v1889_v58, %v3429_v36  ;;  %v1343_v14 = vpop.f32.mrb[13].mxu0 }
 0x239   : > { %v1344_v1 = vadd.f32 %v3429_v36, %v1343_v14  ;;  %v1890_v47 = vpop.f32.mrb[14].mxu0 }
 0x23a   : > { %v1420_v45 = vmax.f32 %v1352_v0, 0.0  ;;  %v1355_v57 = vadd.f32 %v1890_v47, %v3429_v36  ;;  %v1346_v20 = vpop.f32.mrb[15].mxu0 }
 0x23b   : > { %v1418_v53 = vmax.f32 %v1344_v1, 0.0  ;;  %v1347_v5 = vadd.f32 %v3429_v36, %v1346_v20 }
 0x23c   : > { %v1448_v21 = vmin.f32 %v1420_v45, 6.0  ;;  %v1421_v33 = vmax.f32 %v1355_v57, 0.0 }
 0x23d   : > { %v1446_v54 = vmin.f32 %v1418_v53, 6.0  ;;  %v1419_v4 = vmax.f32 %v1347_v5, 0.0 }
 0x23e   : > { %v1822_v13 = vpack.c.bf16 %v1448_v21, %v1448_v21  ;;  %v1449_v3 = vmin.f32 %v1421_v33, 6.0 }
 0x23f   : > { %v1820_v40 = vpack.c.bf16 %v1446_v54, %v1446_v54  ;;  %v1447_v26 = vmin.f32 %v1419_v4, 6.0 }
 0x240   : > { %1588 = vst [vmem:[%s3438_s17 + $0x38] sm:$0xf] %v1822_v13  ;;  %v1823_v60 = vpack.c.bf16 %v1449_v3, %v1449_v3 }
 0x241   : > { %1586 = vst [vmem:[%s3438_s17 + $0x30] sm:$0xf] %v1820_v40  ;;  %v1821_v11 = vpack.c.bf16 %v1447_v26, %v1447_v26 }
 0x242   : > { %1589 = vst [vmem:[%s3438_s17 + $0x3c] sm:$0x7] %v1823_v60 }
 0x243   : > { %1587 = vst [vmem:[%s3438_s17 + $0x34] sm:$0x7] %v1821_v11 }
 0x244 PF: > { %s23_s26 = sadd.s32 1, %s2199_s26   ;;  %s3559_s21 = smov %s2183_s22 }
 0x245   : > { %p20_p8 = scmp.ge.s32.totalorder %s23_s26, 4   ;;  %s3560_s22 = smov %s2187_s23 }
 0x246   : > { %s3561_s23 = smov %s2372_s18  ;;  %s3562_s24 = smov %s2195_s25 }
 0x247   : > { %s3563_s25 = smov %s3565_s13  ;;  %22 = sbr.rel (!%p20_p8) target bundleno = 11 (0xb), region = 105 }
 0x24e   :  { %1634 = vsyncpa [#allocation3], 1 }
 0x24f   :  { %1636 = vsyncpa [#allocation3 + $0x1], 1 }
 0x250   :  { %1637 = vsyncpa [#allocation5], 1 }
 0x251   :  { %1639 = vsyncpa [#allocation5 + $0x1], 1 }
 0x252   :  { %1640 = vsyncpa [#allocation8], 1 }

</bundles_post_ra>
